<compile_context>
chip_gen: v7x
topology: tpu7x:2x2x1
jax: 0.10.0
libtpu: 0.0.40
codegen_flags: <defaults>
</compile_context>

<pallas_src>
import functools

import jax
import jax.numpy as jnp
from jax.experimental import pallas as pl
from jax.experimental.pallas import tpu as pltpu


def _joint_grad_kernel(fus_ref, ir_ref, vi_ref, psum_ref, *,
                       H, W, B, b_tile, need_mask):
    """fus/ir/vi refs: (b_tile, H, W) blocks in VMEM (unpadded).
    psum_ref: (1, 1) f32 block in SMEM -> per-block partial sum of
    |max(|lap_ir|, |lap_vi|) - |lap_fus||  (un-normalized by the 1/16)."""

    def sum3_rows(x):
        # x[i-1] + x[i] + x[i+1] along rows, reflect boundary (pad[-1] = x[1]).
        prev = jnp.concatenate([x[:, 1:2, :], x[:, :H - 1, :]], axis=1)
        nxt = jnp.concatenate([x[:, 1:, :], x[:, H - 2:H - 1, :]], axis=1)
        return prev + x + nxt

    def sum3_cols(x):
        prev = jnp.concatenate([x[:, :, 1:2], x[:, :, :W - 1]], axis=2)
        nxt = jnp.concatenate([x[:, :, 1:], x[:, :, W - 2:W - 1]], axis=2)
        return prev + x + nxt

    def lap_abs_raw(ref):
        x = ref[...].astype(jnp.float32)
        box = sum3_cols(sum3_rows(x))      # 3x3 box sum with reflect padding
        # box - 9*center == [[1,1,1],[1,-8,1],[1,1,1]] (1/16 applied later).
        return jnp.abs(box - 9.0 * x)

    g_max = jnp.maximum(lap_abs_raw(ir_ref), lap_abs_raw(vi_ref))
    diff = jnp.abs(g_max - lap_abs_raw(fus_ref))

    if need_mask:
        # Last grid block may run past B; mask padded images out of the sum.
        b_lo = pl.program_id(0) * b_tile
        idx = jax.lax.broadcasted_iota(jnp.int32, (b_tile, 1, 1), 0)
        diff = jnp.where(b_lo + idx < B, diff, 0.0)

    psum_ref[0, 0] = jnp.sum(diff)


def joint_grad_loss(im_fus, im_ir, im_vi):
    """im_*: (N, C, H, W) arrays. Returns scalar f32 loss == JointGrad.forward."""
    N, C, H, W = im_fus.shape
    assert im_ir.shape == im_fus.shape and im_vi.shape == im_fus.shape
    assert H >= 2 and W >= 2, "reflect padding requires H >= 2 and W >= 2"
    B = N * C

    f = im_fus.reshape(B, H, W)
    i = im_ir.reshape(B, H, W)
    v = im_vi.reshape(B, H, W)

    # Block sizing: keep one input block ~<= 1 MiB so
    #   3 inputs x 2 pipeline buffers x block  +  f32 temporaries
    # stays comfortably inside the smallest scoped-VMEM default (v5e 16 MiB,
    # v7x 32 MiB) while still amortizing the ~0.35us per-grid-step overhead.
    itemsize = jnp.dtype(f.dtype).itemsize
    budget_bytes = 1024 * 1024
    b_tile = int(max(1, min(B, budget_bytes // max(1, H * W * itemsize))))
    nb = pl.cdiv(B, b_tile)
    need_mask = (nb * b_tile != B)
    # TODO(synk): for single images too large to fit a (1, H, W) block in
    # VMEM, add a second grid axis over H row-tiles with a 1-row halo.

    kernel = functools.partial(_joint_grad_kernel, H=H, W=W, B=B,
                               b_tile=b_tile, need_mask=need_mask)
    in_spec = pl.BlockSpec((b_tile, H, W), lambda b: (b, 0, 0))

    psums = pl.pallas_call(
        kernel,
        out_shape=jax.ShapeDtypeStruct((nb, 1), jnp.float32),
        grid=(nb,),
        in_specs=[in_spec, in_spec, in_spec],
        out_specs=pl.BlockSpec((1, 1), lambda b: (b, 0),
                               memory_space=pltpu.MemorySpace.SMEM),
        compiler_params=pltpu.CompilerParams(
            dimension_semantics=("parallel",)),
        cost_estimate=pl.CostEstimate(
            flops=25 * B * H * W,
            transcendentals=0,
            bytes_accessed=3 * B * H * W * itemsize + nb * 4),
    )(f, i, v)

    # Per-block partial sums -> final mean; fold in the kornia 1/16 kernel
    # normalization here (homogeneous through abs/max/L1).
    return jnp.sum(psums) * (1.0 / (16.0 * float(B * H * W)))


def _reference(im_fus, im_ir, im_vi):
    """Pure-JAX reference for sanity checking."""
    k = jnp.array([[1., 1., 1.], [1., -8., 1.], [1., 1., 1.]], jnp.float32) / 16.0

    def lap_abs(x):
        N, C, H, W = x.shape
        xp = jnp.pad(x.astype(jnp.float32),
                     ((0, 0), (0, 0), (1, 1), (1, 1)), mode="reflect")
        out = jnp.zeros((N, C, H, W), jnp.float32)
        for dy in range(3):
            for dx in range(3):
                out = out + k[dy, dx] * xp[:, :, dy:dy + H, dx:dx + W]
        return jnp.abs(out)

    fg, ig, vg = lap_abs(im_fus), lap_abs(im_ir), lap_abs(im_vi)
    return jnp.mean(jnp.abs(jnp.maximum(ig, vg) - fg))


if __name__ == "__main__":
    key = jax.random.PRNGKey(0)
    k1, k2, k3 = jax.random.split(key, 3)
    N, C, H, W = 2, 4, 16, 16  # small NCHW images
    im_fus = jax.random.uniform(k1, (N, C, H, W), jnp.float32)
    im_ir = jax.random.uniform(k2, (N, C, H, W), jnp.float32)
    im_vi = jax.random.uniform(k3, (N, C, H, W), jnp.float32)

    loss = jax.block_until_ready(joint_grad_loss(im_fus, im_ir, im_vi))
    ref = jax.block_until_ready(_reference(im_fus, im_ir, im_vi))

    assert jnp.allclose(loss, ref, atol=1e-5, rtol=1e-5), (loss, ref)
    print("KERNEL_OK")
</pallas_src>

<mosaic_0001>
module attributes {stable_mosaic.version = 11 : i64} {
  func.func @_joint_grad_kernel(%arg0: i32, %arg1: memref<8x16x16xf32, #tpu.memory_space<vmem>>, %arg2: memref<8x16x16xf32, #tpu.memory_space<vmem>>, %arg3: memref<8x16x16xf32, #tpu.memory_space<vmem>>, %arg4: memref<1x1xf32, #tpu.memory_space<smem>>) attributes {dimension_semantics = [#tpu.dimension_semantics<parallel>], iteration_bounds = array<i64: 1>, scalar_prefetch = 0 : i64, scratch_operands = 0 : i64, tpu.core_type = #tpu.core_type<tc>, window_params = [{transform_indices = @transform_0, window_bounds = array<i64: 8, 16, 16>}, {transform_indices = @transform_1, window_bounds = array<i64: 8, 16, 16>}, {transform_indices = @transform_2, window_bounds = array<i64: 8, 16, 16>}, {transform_indices = @transform_3, window_bounds = array<i64: 1, 1>}]} {
    %c0 = arith.constant 0 : index
    %c0_0 = arith.constant 0 : index
    %c0_1 = arith.constant 0 : index
    %0 = vector.load %arg2[%c0, %c0_0, %c0_1] : memref<8x16x16xf32, #tpu.memory_space<vmem>>, vector<8x16x16xf32>
    %1 = vector.extract_strided_slice %0 {offsets = [0, 1, 0], sizes = [8, 1, 16], strides = [1, 1, 1]} : vector<8x16x16xf32> to vector<8x1x16xf32>
    %2 = vector.extract_strided_slice %0 {offsets = [0, 0, 0], sizes = [8, 15, 16], strides = [1, 1, 1]} : vector<8x16x16xf32> to vector<8x15x16xf32>
    %3 = tpu.concatenate %1, %2 in 1 : vector<8x1x16xf32>, vector<8x15x16xf32> -> vector<8x16x16xf32>
    %4 = vector.extract_strided_slice %0 {offsets = [0, 1, 0], sizes = [8, 15, 16], strides = [1, 1, 1]} : vector<8x16x16xf32> to vector<8x15x16xf32>
    %5 = vector.extract_strided_slice %0 {offsets = [0, 14, 0], sizes = [8, 1, 16], strides = [1, 1, 1]} : vector<8x16x16xf32> to vector<8x1x16xf32>
    %6 = tpu.concatenate %4, %5 in 1 : vector<8x15x16xf32>, vector<8x1x16xf32> -> vector<8x16x16xf32>
    %7 = arith.addf %3, %0 : vector<8x16x16xf32>
    %8 = arith.addf %7, %6 : vector<8x16x16xf32>
    %9 = vector.extract_strided_slice %8 {offsets = [0, 0, 1], sizes = [8, 16, 1], strides = [1, 1, 1]} : vector<8x16x16xf32> to vector<8x16x1xf32>
    %10 = vector.extract_strided_slice %8 {offsets = [0, 0, 0], sizes = [8, 16, 15], strides = [1, 1, 1]} : vector<8x16x16xf32> to vector<8x16x15xf32>
    %11 = tpu.concatenate %9, %10 in 2 : vector<8x16x1xf32>, vector<8x16x15xf32> -> vector<8x16x16xf32>
    %12 = vector.extract_strided_slice %8 {offsets = [0, 0, 1], sizes = [8, 16, 15], strides = [1, 1, 1]} : vector<8x16x16xf32> to vector<8x16x15xf32>
    %13 = vector.extract_strided_slice %8 {offsets = [0, 0, 14], sizes = [8, 16, 1], strides = [1, 1, 1]} : vector<8x16x16xf32> to vector<8x16x1xf32>
    %14 = tpu.concatenate %12, %13 in 2 : vector<8x16x15xf32>, vector<8x16x1xf32> -> vector<8x16x16xf32>
    %15 = arith.addf %11, %8 : vector<8x16x16xf32>
    %16 = arith.addf %15, %14 : vector<8x16x16xf32>
    %cst = arith.constant 9.000000e+00 : f32
    %17 = vector.broadcast %cst : f32 to vector<8x16x16xf32>
    %18 = arith.mulf %17, %0 : vector<8x16x16xf32>
    %19 = arith.subf %16, %18 : vector<8x16x16xf32>
    %20 = math.absf %19 : vector<8x16x16xf32>
    %c0_2 = arith.constant 0 : index
    %c0_3 = arith.constant 0 : index
    %c0_4 = arith.constant 0 : index
    %21 = vector.load %arg3[%c0_2, %c0_3, %c0_4] : memref<8x16x16xf32, #tpu.memory_space<vmem>>, vector<8x16x16xf32>
    %22 = vector.extract_strided_slice %21 {offsets = [0, 1, 0], sizes = [8, 1, 16], strides = [1, 1, 1]} : vector<8x16x16xf32> to vector<8x1x16xf32>
    %23 = vector.extract_strided_slice %21 {offsets = [0, 0, 0], sizes = [8, 15, 16], strides = [1, 1, 1]} : vector<8x16x16xf32> to vector<8x15x16xf32>
    %24 = tpu.concatenate %22, %23 in 1 : vector<8x1x16xf32>, vector<8x15x16xf32> -> vector<8x16x16xf32>
    %25 = vector.extract_strided_slice %21 {offsets = [0, 1, 0], sizes = [8, 15, 16], strides = [1, 1, 1]} : vector<8x16x16xf32> to vector<8x15x16xf32>
    %26 = vector.extract_strided_slice %21 {offsets = [0, 14, 0], sizes = [8, 1, 16], strides = [1, 1, 1]} : vector<8x16x16xf32> to vector<8x1x16xf32>
    %27 = tpu.concatenate %25, %26 in 1 : vector<8x15x16xf32>, vector<8x1x16xf32> -> vector<8x16x16xf32>
    %28 = arith.addf %24, %21 : vector<8x16x16xf32>
    %29 = arith.addf %28, %27 : vector<8x16x16xf32>
    %30 = vector.extract_strided_slice %29 {offsets = [0, 0, 1], sizes = [8, 16, 1], strides = [1, 1, 1]} : vector<8x16x16xf32> to vector<8x16x1xf32>
    %31 = vector.extract_strided_slice %29 {offsets = [0, 0, 0], sizes = [8, 16, 15], strides = [1, 1, 1]} : vector<8x16x16xf32> to vector<8x16x15xf32>
    %32 = tpu.concatenate %30, %31 in 2 : vector<8x16x1xf32>, vector<8x16x15xf32> -> vector<8x16x16xf32>
    %33 = vector.extract_strided_slice %29 {offsets = [0, 0, 1], sizes = [8, 16, 15], strides = [1, 1, 1]} : vector<8x16x16xf32> to vector<8x16x15xf32>
    %34 = vector.extract_strided_slice %29 {offsets = [0, 0, 14], sizes = [8, 16, 1], strides = [1, 1, 1]} : vector<8x16x16xf32> to vector<8x16x1xf32>
    %35 = tpu.concatenate %33, %34 in 2 : vector<8x16x15xf32>, vector<8x16x1xf32> -> vector<8x16x16xf32>
    %36 = arith.addf %32, %29 : vector<8x16x16xf32>
    %37 = arith.addf %36, %35 : vector<8x16x16xf32>
    %cst_5 = arith.constant 9.000000e+00 : f32
    %38 = vector.broadcast %cst_5 : f32 to vector<8x16x16xf32>
    %39 = arith.mulf %38, %21 : vector<8x16x16xf32>
    %40 = arith.subf %37, %39 : vector<8x16x16xf32>
    %41 = math.absf %40 : vector<8x16x16xf32>
    %42 = arith.maximumf %20, %41 : vector<8x16x16xf32>
    %c0_6 = arith.constant 0 : index
    %c0_7 = arith.constant 0 : index
    %c0_8 = arith.constant 0 : index
    %43 = vector.load %arg1[%c0_6, %c0_7, %c0_8] : memref<8x16x16xf32, #tpu.memory_space<vmem>>, vector<8x16x16xf32>
    %44 = vector.extract_strided_slice %43 {offsets = [0, 1, 0], sizes = [8, 1, 16], strides = [1, 1, 1]} : vector<8x16x16xf32> to vector<8x1x16xf32>
    %45 = vector.extract_strided_slice %43 {offsets = [0, 0, 0], sizes = [8, 15, 16], strides = [1, 1, 1]} : vector<8x16x16xf32> to vector<8x15x16xf32>
    %46 = tpu.concatenate %44, %45 in 1 : vector<8x1x16xf32>, vector<8x15x16xf32> -> vector<8x16x16xf32>
    %47 = vector.extract_strided_slice %43 {offsets = [0, 1, 0], sizes = [8, 15, 16], strides = [1, 1, 1]} : vector<8x16x16xf32> to vector<8x15x16xf32>
    %48 = vector.extract_strided_slice %43 {offsets = [0, 14, 0], sizes = [8, 1, 16], strides = [1, 1, 1]} : vector<8x16x16xf32> to vector<8x1x16xf32>
    %49 = tpu.concatenate %47, %48 in 1 : vector<8x15x16xf32>, vector<8x1x16xf32> -> vector<8x16x16xf32>
    %50 = arith.addf %46, %43 : vector<8x16x16xf32>
    %51 = arith.addf %50, %49 : vector<8x16x16xf32>
    %52 = vector.extract_strided_slice %51 {offsets = [0, 0, 1], sizes = [8, 16, 1], strides = [1, 1, 1]} : vector<8x16x16xf32> to vector<8x16x1xf32>
    %53 = vector.extract_strided_slice %51 {offsets = [0, 0, 0], sizes = [8, 16, 15], strides = [1, 1, 1]} : vector<8x16x16xf32> to vector<8x16x15xf32>
    %54 = tpu.concatenate %52, %53 in 2 : vector<8x16x1xf32>, vector<8x16x15xf32> -> vector<8x16x16xf32>
    %55 = vector.extract_strided_slice %51 {offsets = [0, 0, 1], sizes = [8, 16, 15], strides = [1, 1, 1]} : vector<8x16x16xf32> to vector<8x16x15xf32>
    %56 = vector.extract_strided_slice %51 {offsets = [0, 0, 14], sizes = [8, 16, 1], strides = [1, 1, 1]} : vector<8x16x16xf32> to vector<8x16x1xf32>
    %57 = tpu.concatenate %55, %56 in 2 : vector<8x16x15xf32>, vector<8x16x1xf32> -> vector<8x16x16xf32>
    %58 = arith.addf %54, %51 : vector<8x16x16xf32>
    %59 = arith.addf %58, %57 : vector<8x16x16xf32>
    %cst_9 = arith.constant 9.000000e+00 : f32
    %60 = vector.broadcast %cst_9 : f32 to vector<8x16x16xf32>
    %61 = arith.mulf %60, %43 : vector<8x16x16xf32>
    %62 = arith.subf %59, %61 : vector<8x16x16xf32>
    %63 = math.absf %62 : vector<8x16x16xf32>
    %64 = arith.subf %42, %63 : vector<8x16x16xf32>
    %65 = math.absf %64 : vector<8x16x16xf32>
    %66 = vector.shape_cast %65 : vector<8x16x16xf32> to vector<1x8x16x16xf32>
    %cst_10 = arith.constant dense<0.000000e+00> : vector<1xf32>
    %67 = vector.multi_reduction <add>, %66, %cst_10 [1, 2, 3] : vector<1x8x16x16xf32> to vector<1xf32>
    %68 = vector.shape_cast %67 : vector<1xf32> to vector<1x1x1x1xf32>
    %69 = vector.extract %68[0, 0, 0, 0] : f32 from vector<1x1x1x1xf32>
    %c0_11 = arith.constant 0 : index
    %c0_12 = arith.constant 0 : index
    %70 = memref.load %arg4[%c0_11, %c0_12] : memref<1x1xf32, #tpu.memory_space<smem>>
    memref.store %69, %arg4[%c0_11, %c0_12] : memref<1x1xf32, #tpu.memory_space<smem>>
    return
  }
  func.func @transform_0(%arg0: i32) -> (i32, i32, i32) {
    %c0_i32 = arith.constant 0 : i32
    %c0_i32_0 = arith.constant 0 : i32
    %c0_i32_1 = arith.constant 0 : i32
    return %arg0, %c0_i32, %c0_i32_0 : i32, i32, i32
  }
  func.func @transform_1(%arg0: i32) -> (i32, i32, i32) {
    %c0_i32 = arith.constant 0 : i32
    %c0_i32_0 = arith.constant 0 : i32
    %c0_i32_1 = arith.constant 0 : i32
    return %arg0, %c0_i32, %c0_i32_0 : i32, i32, i32
  }
  func.func @transform_2(%arg0: i32) -> (i32, i32, i32) {
    %c0_i32 = arith.constant 0 : i32
    %c0_i32_0 = arith.constant 0 : i32
    %c0_i32_1 = arith.constant 0 : i32
    return %arg0, %c0_i32, %c0_i32_0 : i32, i32, i32
  }
  func.func @transform_3(%arg0: i32) -> (i32, i32) {
    %c0_i32 = arith.constant 0 : i32
    %c0_i32_0 = arith.constant 0 : i32
    return %arg0, %c0_i32 : i32, i32
  }
}

</mosaic_0001>

<bundles_post_ra>
// kernel: tpu_custom_call.1
= control target key start
LH: loop header
LB: loop body
LE: loop exit
PB: predicated region body
PF: predicated region fallthrough
CT: control target
= control target key end

     0   :  { %8 = vsyncpa [#allocation3], 0  ;;  %s2575_s0 = inlined_call_operand.hbm [shape: f32[8,16,16], index: 0, kind: input, shape index: {}]   ;;  %s2576_s1 = inlined_call_operand.hbm [shape: f32[8,16,16], index: 1, kind: input, shape index: {}]   ;;  %s2577_s2 = inlined_call_operand.hbm [shape: f32[8,16,16], index: 2, kind: input, shape index: {}]   ;;  %s2578_s3 = inlined_call_operand.hbm [shape: f32[1,1], index: 3, kind: output, shape index: {}]  }
   0x1   :  { %9 = vsyncpa [#allocation6], 0 }
   0x2   :  { %10 = vsyncpa [#allocation4], 0  ;;  %s1462_s12 = smov [#allocation5]   ;;  %s1463_s14 = smov [#allocation2]  }
   0x3   :  { %s28_s13 = sshll.u32 %s1462_s12, 4  ;;  %s16_s15 = sshll.u32 %s1463_s14, 4  ;;  %s29_s13 = int_to_ptr.vmem [resolvable:$true] %s28_s13  ;;  %s1490_s15 = int_to_ptr.vmem [resolvable:$true] %s16_s15 }
   0x4   :  { %s1380_s18 = scalar_lea.hbm %s2576_s1, 2048 }
   0x5   :  { %p1381_p0 = scmp.ne.s32.totalorder %s2576_s1, %s1380_s18  ;;  %p1384_p1 = scmp.lt.u32.totalorder %s1380_s18, %s2576_s1 }
   0x7   :  { %p1386_p2 = pnand %p1384_p1, %p1381_p0 }
   0x9   :  { %1389 = shalt.err (!%p1386_p2)
}
   0xa   :  { %s1390_s23 = scalar_lea.vmem %s29_s13, 2048  ;;  %p1395_p4 = scmp.lt.s32.totalorder %s29_s13, %s29_s13 }
   0xb   :  { %p1391_p3 = scmp.ne.s32.totalorder %s29_s13, %s1390_s23  ;;  %p1396_p5 = scmp.lt.s32.totalorder %s1390_s23, %s1390_s23 }
   0xd   :  { %p1397_p6 = por %p1396_p5, %p1395_p4 }
   0xf   :  { %p1398_p7 = pnand %p1397_p6, %p1391_p3 }
  0x11   :  { %1401 = shalt.err (!%p1398_p7)
}
  0x12   :  { %s1464_s24 = smov 128   ;;  %s1465_s25 = smov 8  }
  0x13   :  { %34 = dma.hbm_to_vmem [thread:$0]  %s2576_s1, 2048, %s29_s13, [#allocation6], %s1464_s24, %s1464_s24, %s1465_s25  }
  0x14   :  { %s1402_s30 = scalar_lea.hbm %s2575_s0, 2048 }
  0x15   :  { %p1403_p8 = scmp.ne.s32.totalorder %s2575_s0, %s1402_s30  ;;  %p1406_p9 = scmp.lt.u32.totalorder %s1402_s30, %s2575_s0 }
  0x17   :  { %p1408_p10 = pnand %p1406_p9, %p1403_p8 }
  0x19   :  { %1411 = shalt.err (!%p1408_p10)
}
  0x1a   :  { %s1412_s8 = scalar_lea.vmem %s1490_s15, 2048  ;;  %p1417_p12 = scmp.lt.s32.totalorder %s1490_s15, %s1490_s15 }
  0x1b   :  { %p1413_p11 = scmp.ne.s32.totalorder %s1490_s15, %s1412_s8  ;;  %p1418_p13 = scmp.lt.s32.totalorder %s1412_s8, %s1412_s8 }
  0x1d   :  { %p1419_p0 = por %p1418_p13, %p1417_p12 }
  0x1f   :  { %p1420_p1 = pnand %p1419_p0, %p1413_p11 }
  0x21   :  { %1423 = shalt.err (!%p1420_p1)
}
  0x22   :  { %22 = dma.hbm_to_vmem [thread:$0]  %s2575_s0, 2048, %s1490_s15, [#allocation3], %s1464_s24, %s1464_s24, %s1465_s25  }
  0x23   :  { %s1466_s10 = smov [#allocation7]   ;;  %s1424_s14 = scalar_lea.hbm %s2577_s2, 2048 }
  0x24   :  { %s40_s11 = sshll.u32 %s1466_s10, 4  ;;  %p1425_p2 = scmp.ne.s32.totalorder %s2577_s2, %s1424_s14  ;;  %s41_s11 = int_to_ptr.vmem [resolvable:$true] %s40_s11 }
  0x25   :  { %p1428_p3 = scmp.lt.u32.totalorder %s1424_s14, %s2577_s2 }
  0x27   :  { %p1430_p4 = pnand %p1428_p3, %p1425_p2 }
  0x29   :  { %1433 = shalt.err (!%p1430_p4)
}
  0x2a   :  { %s1434_s20 = scalar_lea.vmem %s41_s11, 2048  ;;  %p1439_p6 = scmp.lt.s32.totalorder %s41_s11, %s41_s11 }
  0x2b   :  { %p1435_p5 = scmp.ne.s32.totalorder %s41_s11, %s1434_s20  ;;  %p1440_p7 = scmp.lt.s32.totalorder %s1434_s20, %s1434_s20 }
  0x2d   :  { %p1441_p8 = por %p1440_p7, %p1439_p6 }
  0x2f   :  { %p1442_p9 = pnand %p1441_p8, %p1435_p5 }
  0x31   :  { %1445 = shalt.err (!%p1442_p9)
}
  0x32   :  { %46 = dma.hbm_to_vmem [thread:$0]  %s2577_s2, 2048, %s41_s11, [#allocation6], %s1464_s24, %s1464_s24, %s1465_s25  }
  0x33   :  { %1456 = dma.done.wait [#allocation3], 2048  }
  0x34   :  { %1457 = vsyncadd [#allocation3], 4294965248 }
  0x35   :  { %1458 = dma.done.wait [#allocation6], 4096  }
  0x36   :  { %1459 = vsyncadd [#allocation6], 4294963200  ;;  %v1542_v0 = vld [vmem:[#allocation5] sm:$0xff]  ;;  %v1544_v1 = vld [vmem:[#allocation5 + $0x8] sm:$0xff]  ;;  %vm104_vm0 = vcmask 1040384   ;;  %vm153_vm1 = vcmask 1046528  }
  0x37   :  { %v1546_v2 = vld [vmem:[#allocation7] sm:$0xff]  ;;  %v80_v3 = vrot.slane %v1542_v0, 1  ;;  %v105_v4 = vrot.slane %v1542_v0, 7  ;;  %v154_v5 = vrot.slane %v1544_v1, 1  ;;  %v106_v6 = vrot.slane %v1544_v1, 7  ;;  %v1552_v7 = vld [vmem:[#allocation7 + $0x8] sm:$0xff] }
  0x38   :  { %v508_v8 = vrot.slane %v1546_v2, 7  ;;  %v509_v9 = vrot.slane %v1552_v7, 7  ;;  %v484_v10 = vrot.slane %v1546_v2, 1  ;;  %v556_v18 = vrot.slane %v1552_v7, 1  ;;  %v1568_v21 = vld [vmem:[#allocation5 + $0x10] sm:$0xff]  ;;  %s1467_s2 = smov 1  }
  0x39   :  { %v145_v11 = vsel %vm104_vm0, %v80_v3, %v105_v4  ;;  %v155_v12 = vsel %vm153_vm1, %v80_v3, %v154_v5  ;;  %v107_v13 = vsel %vm104_vm0, %v105_v4, %v106_v6  ;;  %v194_v16 = vsel %vm153_vm1, %v154_v5, %v106_v6  ;;  %s1468_s21 = smov 127   ;;  %v1582_v29 = vld [vmem:[#allocation5 + $0x18] sm:$0xff]  ;;  %v1584_v30 = vld [vmem:[#allocation7 + $0x10] sm:$0xff]  ;;  %v1600_v38 = vld [vmem:[#allocation2] sm:$0xff]  ;;  %s1446_s25 = scalar_lea.hbm %s2578_s3, 16 }
  0x3a   :  { %v202_v14 = vadd.f32 %v145_v11, %v1542_v0  ;;  %v203_v15 = vadd.f32 %v107_v13, %v1544_v1  ;;  %v510_v17 = vsel %vm104_vm0, %v508_v8, %v509_v9  ;;  %v548_v19 = vsel %vm104_vm0, %v484_v10, %v508_v8  ;;  %v1596_v35 = vld [vmem:[#allocation7 + $0x18] sm:$0xff]  ;;  %v1602_v39 = vld [vmem:[#allocation2 + $0x8] sm:$0xff]  ;;  %v1647_v63 = vld [vmem:[#allocation2 + $0x10] sm:$0xff]  ;;  %p1447_p10 = scmp.ne.s32.totalorder %s2578_s3, %s1446_s25  ;;  %p1450_p11 = scmp.lt.u32.totalorder %s1446_s25, %s2578_s3 }
  0x3b   :  { %v605_v23 = vadd.f32 %v510_v17, %v1552_v7  ;;  %v604_v24 = vadd.f32 %v548_v19, %v1546_v2  ;;  %v596_v25 = vsel %vm153_vm1, %v556_v18, %v509_v9  ;;  %v557_v26 = vsel %vm153_vm1, %v484_v10, %v556_v18  ;;  %v1656_v6 = vld [vmem:[#allocation2 + $0x18] sm:$0xff]  ;;  %v1660_v10 = vld [vmem:[#allocation5 + $0x20] sm:$0xff]  ;;  %v1674_v18 = vld [vmem:[#allocation5 + $0x28] sm:$0xff] }
  0x3c   :  { %v1566_v20 = vadd.f32 %v202_v14, %v155_v12  ;;  %v1574_v22 = vadd.f32 %v203_v15, %v194_v16  ;;  %v81_v27 = vrot.slane %v1568_v21, 1  ;;  %v108_v28 = vrot.slane %v1568_v21, 7  ;;  %v1676_v19 = vld [vmem:[#allocation7 + $0x20] sm:$0xff]  ;;  %p1452_p12 = pnand %p1450_p11, %p1447_p10 }
  0x3d   :  { %v1590_v31 = vadd.f32 %v605_v23, %v596_v25  ;;  %v1592_v32 = vadd.f32 %v604_v24, %v557_v26  ;;  %v156_v34 = vrot.slane %v1582_v29, 1  ;;  %v485_v36 = vrot.slane %v1584_v30, 1 }
  0x3e   :  { %298 = vrot.lane.b32.xlu1 %v1566_v20, %s1467_s2  ;;  %250 = vrot.lane.b32.xlu0 %v1566_v20, %s1468_s21  ;;  %v146_v33 = vsel %vm104_vm0, %v81_v27, %v108_v28  ;;  %v511_v37 = vrot.slane %v1584_v30, 7  ;;  %v558_v41 = vrot.slane %v1596_v35, 1  ;;  %v924_v42 = vrot.slane %v1600_v38, 7 }
  0x3f   :  { %v204_v40 = vadd.f32 %v146_v33, %v1568_v21  ;;  %v157_v43 = vsel %vm153_vm1, %v81_v27, %v156_v34  ;;  %v925_v45 = vrot.slane %v1602_v39, 7  ;;  %v900_v46 = vrot.slane %v1600_v38, 1 }
  0x40   :  { %v549_v44 = vsel %vm104_vm0, %v485_v36, %v511_v37  ;;  %v559_v49 = vsel %vm153_vm1, %v485_v36, %v558_v41  ;;  %v972_v51 = vrot.slane %v1602_v39, 1  ;;  %v109_v58 = vrot.slane %v1582_v29, 7 }
  0x41   :  { %v1619_v47 = vadd.f32 %v204_v40, %v157_v43  ;;  %v606_v48 = vadd.f32 %v549_v44, %v1584_v30  ;;  %v926_v50 = vsel %vm104_vm0, %v924_v42, %v925_v45  ;;  %v964_v52 = vsel %vm104_vm0, %v900_v46, %v924_v42 }
  0x42   :  { %300 = vrot.lane.b32.xlu1 %v1574_v22, %s1467_s2  ;;  %252 = vrot.lane.b32.xlu0 %v1574_v22, %s1468_s21  ;;  %v1021_v54 = vadd.f32 %v926_v50, %v1602_v39  ;;  %v1020_v55 = vadd.f32 %v964_v52, %v1600_v38  ;;  %v1012_v56 = vsel %vm153_vm1, %v972_v51, %v925_v45  ;;  %v512_v62 = vrot.slane %v1596_v35, 7 }
  0x43   :  { %v1630_v53 = vadd.f32 %v606_v48, %v559_v49  ;;  %v973_v57 = vsel %vm153_vm1, %v900_v46, %v972_v51  ;;  %v110_v61 = vsel %vm104_vm0, %v108_v28, %v109_v58  ;;  %v195_v4 = vsel %vm153_vm1, %v156_v34, %v109_v58  ;;  %v1690_v34 = vld [vmem:[#allocation7 + $0x28] sm:$0xff] }
  0x44   :  { %v1641_v59 = vadd.f32 %v1021_v54, %v1012_v56  ;;  %v1643_v60 = vadd.f32 %v1020_v55, %v973_v57  ;;  %v205_v3 = vadd.f32 %v110_v61, %v1582_v29  ;;  %v513_v5 = vsel %vm104_vm0, %v511_v37, %v512_v62  ;;  %v1723_v56 = vld [vmem:[#allocation2 + $0x20] sm:$0xff] }
  0x45   :  { %v901_v8 = vrot.slane %v1647_v63, 1  ;;  %v927_v9 = vrot.slane %v1647_v63, 7  ;;  %v607_v12 = vadd.f32 %v513_v5, %v1596_v35  ;;  %v974_v13 = vrot.slane %v1656_v6, 1  ;;  %v1736_v5 = vld [vmem:[#allocation2 + $0x28] sm:$0xff] }
  0x46   :  { %654 = vrot.lane.b32.xlu1 %v1590_v31, %s1468_s21  ;;  %652 = vrot.lane.b32.xlu0 %v1592_v32, %s1468_s21  ;;  %v1666_v11 = vadd.f32 %v205_v3, %v195_v4  ;;  %v597_v14 = vsel %vm153_vm1, %v558_v41, %v512_v62  ;;  %v82_v16 = vrot.slane %v1660_v10, 1  ;;  %v111_v17 = vrot.slane %v1660_v10, 7  ;;  %2611 = vst [vmem:[#allocation12_spill] sm:$0xff] %v1736_v5 }
  0x47   :  { %v965_v15 = vsel %vm104_vm0, %v901_v8, %v927_v9  ;;  %v1682_v23 = vadd.f32 %v607_v12, %v597_v14  ;;  %v975_v24 = vsel %vm153_vm1, %v901_v8, %v974_v13  ;;  %v158_v27 = vrot.slane %v1674_v18, 1  ;;  %v1738_v8 = vld [vmem:[#allocation5 + $0x30] sm:$0xff] }
  0x48   :  { %v1022_v25 = vadd.f32 %v965_v15, %v1647_v63  ;;  %v147_v26 = vsel %vm104_vm0, %v82_v16, %v111_v17  ;;  %v486_v28 = vrot.slane %v1676_v19, 1  ;;  %v514_v33 = vrot.slane %v1676_v19, 7 }
  0x49   :  { %v206_v37 = vadd.f32 %v147_v26, %v1660_v10  ;;  %v159_v40 = vsel %vm153_vm1, %v82_v16, %v158_v27  ;;  %v560_v42 = vrot.slane %v1690_v34, 1  ;;  %v928_v43 = vrot.slane %v1656_v6, 7  ;;  %v1750_v16 = vld [vmem:[#allocation5 + $0x38] sm:$0xff] }
  0x4a   :  { %702 = vrot.lane.b32.xlu1 %v1590_v31, %s1467_s2  ;;  %700 = vrot.lane.b32.xlu0 %v1592_v32, %s1467_s2  ;;  %v1696_v36 = vadd.f32 %v1022_v25, %v975_v24  ;;  %v550_v41 = vsel %vm104_vm0, %v486_v28, %v514_v33  ;;  %v112_v49 = vrot.slane %v1674_v18, 7  ;;  %v515_v55 = vrot.slane %v1690_v34, 7  ;;  %2612 = vst [vmem:[#allocation13_spill] sm:$0xff] %v1750_v16  ;;  %v1754_v25 = vld [vmem:[#allocation7 + $0x30] sm:$0xff] }
  0x4b   :  { %v1707_v44 = vadd.f32 %v206_v37, %v159_v40  ;;  %v608_v45 = vadd.f32 %v550_v41, %v1676_v19  ;;  %v561_v46 = vsel %vm153_vm1, %v486_v28, %v560_v42  ;;  %v929_v48 = vsel %vm104_vm0, %v927_v9, %v928_v43 }
  0x4c   :  { %v1023_v51 = vadd.f32 %v929_v48, %v1656_v6  ;;  %v1013_v52 = vsel %vm153_vm1, %v974_v13, %v928_v43  ;;  %v113_v54 = vsel %vm104_vm0, %v111_v17, %v112_v49  ;;  %v196_v61 = vsel %vm153_vm1, %v158_v27, %v112_v49 }
  0x4d   :  { %v1717_v50 = vadd.f32 %v608_v45, %v561_v46  ;;  %v207_v58 = vadd.f32 %v113_v54, %v1674_v18  ;;  %v516_v62 = vsel %vm104_vm0, %v514_v33, %v515_v55  ;;  %v902_v3 = vrot.slane %v1723_v56, 1 }
  0x4e   :  { %302 = vrot.lane.b32.xlu1 %v1619_v47, %s1467_s2  ;;  %254 = vrot.lane.b32.xlu0 %v1619_v47, %s1468_s21  ;;  %v1729_v57 = vadd.f32 %v1023_v51, %v1013_v52  ;;  %v930_v4 = vrot.slane %v1723_v56, 7  ;;  %v598_v12 = vsel %vm153_vm1, %v560_v42, %v515_v55  ;;  %v609_v13 = vadd.f32 %v516_v62, %v1690_v34  ;;  %v1768_v42 = vld [vmem:[#allocation7 + $0x38] sm:$0xff] }
  0x4f   :  { %v1744_v9 = vadd.f32 %v207_v58, %v196_v61  ;;  %v976_v15 = vrot.slane %v1736_v5, 1  ;;  %v83_v17 = vrot.slane %v1738_v8, 1  ;;  %v114_v24 = vrot.slane %v1738_v8, 7  ;;  %2613 = vst [vmem:[#allocation14_spill] sm:$0xff] %v1768_v42 }
  0x50   :  { %v966_v14 = vsel %vm104_vm0, %v902_v3, %v930_v4  ;;  %v1760_v26 = vadd.f32 %v609_v13, %v598_v12  ;;  %v160_v28 = vrot.slane %v1750_v16, 1  ;;  %v487_v40 = vrot.slane %v1754_v25, 1 }
  0x51   :  { %v1024_v27 = vadd.f32 %v966_v14, %v1723_v56  ;;  %v977_v33 = vsel %vm153_vm1, %v902_v3, %v976_v15  ;;  %v148_v37 = vsel %vm104_vm0, %v83_v17, %v114_v24  ;;  %v517_v41 = vrot.slane %v1754_v25, 7 }
  0x52   :  { %704 = vrot.lane.b32.xlu1 %v1630_v53, %s1467_s2  ;;  %656 = vrot.lane.b32.xlu0 %v1630_v53, %s1468_s21  ;;  %v208_v45 = vadd.f32 %v148_v37, %v1738_v8  ;;  %v161_v46 = vsel %vm153_vm1, %v83_v17, %v160_v28  ;;  %v562_v49 = vrot.slane %v1768_v42, 1  ;;  %v931_v51 = vrot.slane %v1736_v5, 7  ;;  %v1801_v17 = vld [vmem:[#allocation2 + $0x30] sm:$0xff] }
  0x53   :  { %v1774_v43 = vadd.f32 %v1024_v27, %v977_v33  ;;  %v551_v48 = vsel %vm104_vm0, %v487_v40, %v517_v41  ;;  %v115_v61 = vrot.slane %v1750_v16, 7  ;;  %v518_v14 = vrot.slane %v1768_v42, 7  ;;  %2615 = vst [vmem:[#allocation16_spill] sm:$0xff] %v1801_v17 }
  0x54   :  { %v1785_v52 = vadd.f32 %v208_v45, %v161_v46  ;;  %v610_v54 = vadd.f32 %v551_v48, %v1754_v25  ;;  %v563_v55 = vsel %vm153_vm1, %v487_v40, %v562_v49  ;;  %v932_v58 = vsel %vm104_vm0, %v930_v4, %v931_v51  ;;  %v1814_v40 = vld [vmem:[#allocation2 + $0x38] sm:$0xff]  ;;  %v1816_v45 = vld [vmem:[#allocation5 + $0x40] sm:$0xff] }
  0x55   :  { %v1025_v3 = vadd.f32 %v932_v58, %v1736_v5  ;;  %v1014_v12 = vsel %vm153_vm1, %v976_v15, %v931_v51  ;;  %v116_v13 = vsel %vm104_vm0, %v114_v24, %v115_v61  ;;  %v197_v33 = vsel %vm153_vm1, %v160_v28, %v115_v61  ;;  %2617 = vst [vmem:[#allocation18_spill] sm:$0xff] %v1814_v40  ;;  %v1832_v61 = vld [vmem:[#allocation7 + $0x40] sm:$0xff] }
  0x56   :  { %1070 = vrot.lane.b32.xlu1 %v1641_v59, %s1468_s21  ;;  %1068 = vrot.lane.b32.xlu0 %v1643_v60, %s1468_s21  ;;  %v1795_v62 = vadd.f32 %v610_v54, %v563_v55  ;;  %v209_v27 = vadd.f32 %v116_v13, %v1750_v16  ;;  %v519_v15 = vsel %vm104_vm0, %v517_v41, %v518_v14  ;;  %v903_v24 = vrot.slane %v1801_v17, 1  ;;  %v1828_v54 = vld [vmem:[#allocation5 + $0x48] sm:$0xff] }
  0x57   :  { %v1807_v4 = vadd.f32 %v1025_v3, %v1014_v12  ;;  %v933_v37 = vrot.slane %v1801_v17, 7  ;;  %2618 = vst [vmem:[#allocation19_spill] sm:$0xff] %v1816_v45  ;;  %v599_v28 = vsel %vm153_vm1, %v562_v49, %v518_v14  ;;  %v611_v41 = vadd.f32 %v519_v15, %v1768_v42  ;;  %2620 = vst [vmem:[#allocation21_spill] sm:$0xff] %v1828_v54  ;;  %v1846_v15 = vld [vmem:[#allocation7 + $0x48] sm:$0xff] }
  0x58   :  { %2614 = vst [vmem:[#allocation15_spill] sm:$0xff] %v1795_v62  ;;  %v1822_v46 = vadd.f32 %v209_v27, %v197_v33  ;;  %v978_v51 = vrot.slane %v1814_v40, 1  ;;  %v84_v55 = vrot.slane %v1816_v45, 1  ;;  %v117_v58 = vrot.slane %v1816_v45, 7  ;;  %2621 = vst [vmem:[#allocation22_spill] sm:$0xff] %v1832_v61 }
  0x59   :  { %2616 = vst [vmem:[#allocation17_spill] sm:$0xff] %v1807_v4  ;;  %v967_v48 = vsel %vm104_vm0, %v903_v24, %v933_v37  ;;  %v1838_v49 = vadd.f32 %v611_v41, %v599_v28  ;;  %v162_v12 = vrot.slane %v1828_v54, 1  ;;  %v488_v27 = vrot.slane %v1832_v61, 1  ;;  %2623 = vst [vmem:[#allocation24_spill] sm:$0xff] %v1846_v15 }
  0x5a   :  { %1118 = vrot.lane.b32.xlu1 %v1641_v59, %s1467_s2  ;;  %1116 = vrot.lane.b32.xlu0 %v1643_v60, %s1467_s2  ;;  %2619 = vst [vmem:[#allocation20_spill] sm:$0xff] %v1822_v46  ;;  %v1026_v3 = vadd.f32 %v967_v48, %v1801_v17  ;;  %v979_v13 = vsel %vm153_vm1, %v903_v24, %v978_v51  ;;  %v520_v33 = vrot.slane %v1832_v61, 7  ;;  %v564_v17 = vrot.slane %v1846_v15, 1 }
  0x5b   :  { %2622 = vst [vmem:[#allocation23_spill] sm:$0xff] %v1838_v49  ;;  %v149_v14 = vsel %vm104_vm0, %v84_v55, %v117_v58  ;;  %v163_v24 = vsel %vm153_vm1, %v84_v55, %v162_v12  ;;  %v934_v42 = vrot.slane %v1814_v40, 7  ;;  %vm346_vm2 = vcmask 7168  }
  0x5c   :  { %v1852_v28 = vadd.f32 %v1026_v3, %v979_v13  ;;  %v210_v41 = vadd.f32 %v149_v14, %v1816_v45  ;;  %v552_v48 = vsel %vm104_vm0, %v488_v27, %v520_v33  ;;  %v565_v13 = vsel %vm153_vm1, %v488_v27, %v564_v17 }
  0x5d   :  { %v612_v3 = vadd.f32 %v552_v48, %v1832_v61  ;;  %v935_v55 = vsel %vm104_vm0, %v933_v37, %v934_v42  ;;  %v118_v14 = vrot.slane %v1828_v54, 7  ;;  %v521_v27 = vrot.slane %v1846_v15, 7  ;;  %v1879_v48 = vld [vmem:[#allocation2 + $0x40] sm:$0xff]  ;;  %v470_v61 = vld [vmem:[#allocation7 + $0x50] sm:$0xff] }
  0x5e   :  { %304 = vrot.lane.b32.xlu1 %v1666_v11, %s1467_s2  ;;  %256 = vrot.lane.b32.xlu0 %v1666_v11, %s1468_s21  ;;  %2624 = vst [vmem:[#allocation25_spill] sm:$0xff] %v1852_v28  ;;  %2627 = vst [vmem:[#allocation28_spill] sm:$0xff] %v1879_v48  ;;  %vm363_vm3 = vcmask 121856   ;;  %vm1308_vm4 = vcmask 130048  }
  0x5f   :  { %v1873_v45 = vadd.f32 %v612_v3, %v565_v13  ;;  %v198_v13 = vsel %vm153_vm1, %v162_v12, %v118_v14 }
  0x61   :  { %2626 = vst [vmem:[#allocation27_spill] sm:$0xff] %v1873_v45 }
  0x62   :  { %706 = vrot.lane.b32.xlu1 %v1682_v23, %s1467_s2  ;;  %658 = vrot.lane.b32.xlu0 %v1682_v23, %s1468_s21 }
  0x66   :  { %1120 = vrot.lane.b32.xlu1 %v1696_v36, %s1467_s2  ;;  %1072 = vrot.lane.b32.xlu0 %v1696_v36, %s1468_s21 }
  0x6a   :  { %306 = vrot.lane.b32.xlu1 %v1707_v44, %s1467_s2  ;;  %258 = vrot.lane.b32.xlu0 %v1707_v44, %s1468_s21 }
  0x6e   :  { %708 = vrot.lane.b32.xlu1 %v1717_v50, %s1467_s2  ;;  %660 = vrot.lane.b32.xlu0 %v1717_v50, %s1468_s21 }
  0x72   :  { %1122 = vrot.lane.b32.xlu1 %v1729_v57, %s1467_s2  ;;  %1074 = vrot.lane.b32.xlu0 %v1729_v57, %s1468_s21 }
  0x76   :  { %308 = vrot.lane.b32.xlu1 %v1744_v9, %s1467_s2  ;;  %260 = vrot.lane.b32.xlu0 %v1744_v9, %s1468_s21 }
  0x7a   :  { %710 = vrot.lane.b32.xlu1 %v1760_v26, %s1467_s2  ;;  %662 = vrot.lane.b32.xlu0 %v1760_v26, %s1468_s21 }
  0x7e   :  { %1124 = vrot.lane.b32.xlu1 %v1774_v43, %s1467_s2  ;;  %1076 = vrot.lane.b32.xlu0 %v1774_v43, %s1468_s21 }
  0x82   :  { %310 = vrot.lane.b32.xlu1 %v1785_v52, %s1467_s2  ;;  %262 = vrot.lane.b32.xlu0 %v1785_v52, %s1468_s21 }
  0x86   :  { %712 = vrot.lane.b32.xlu1 %v1795_v62, %s1467_s2  ;;  %664 = vrot.lane.b32.xlu0 %v1795_v62, %s1468_s21  ;;  %v1940_v62 = vld [vmem:[#allocation2 + $0x50] sm:$0xff] }
  0x8a   :  { %1126 = vrot.lane.b32.xlu1 %v1807_v4, %s1467_s2  ;;  %1078 = vrot.lane.b32.xlu0 %v1807_v4, %s1468_s21 }
  0x8e   :  { %312 = vrot.lane.b32.xlu1 %v1822_v46, %s1467_s2  ;;  %264 = vrot.lane.b32.xlu0 %v1822_v46, %s1468_s21  ;;  %v1863_v46 = vadd.f32 %v210_v41, %v163_v24  ;;  %v1015_v41 = vsel %vm153_vm1, %v978_v51, %v934_v42  ;;  %v119_v24 = vsel %vm104_vm0, %v117_v58, %v118_v14  ;;  %v904_v51 = vrot.slane %v1879_v48, 1 }
  0x8f   :  { %v211_v3 = vadd.f32 %v119_v24, %v1828_v54  ;;  %v522_v42 = vsel %vm104_vm0, %v520_v33, %v521_v27  ;;  %v936_v58 = vrot.slane %v1879_v48, 7  ;;  %v1904_v24 = vld [vmem:[#allocation5 + $0x58] sm:$0xff] }
  0x90   :  { %2625 = vst [vmem:[#allocation26_spill] sm:$0xff] %v1863_v46  ;;  %v613_v12 = vadd.f32 %v522_v42, %v1846_v15  ;;  %v489_v15 = vrot.slane %v470_v61, 1 }
  0x91   :  { %v968_v33 = vsel %vm104_vm0, %v904_v51, %v936_v58 }
  0x92   :  { %714 = vrot.lane.b32.xlu1 %v1838_v49, %s1467_s2  ;;  %666 = vrot.lane.b32.xlu0 %v1838_v49, %s1468_s21 }
  0x96   :  { %1128 = vrot.lane.b32.xlu1 %v1852_v28, %s1467_s2  ;;  %1080 = vrot.lane.b32.xlu0 %v1852_v28, %s1468_s21  ;;  %v1027_v28 = vadd.f32 %v935_v55, %v1814_v40  ;;  %v1892_v55 = vld [vmem:[#allocation2 + $0x48] sm:$0xff]  ;;  %v66_v40 = vld [vmem:[#allocation5 + $0x50] sm:$0xff] }
  0x97   :  { %v980_v14 = vrot.slane %v1892_v55, 1  ;;  %v85_v54 = vrot.slane %v66_v40, 1 }
  0x98   :  { %v1885_v37 = vadd.f32 %v1027_v28, %v1015_v41  ;;  %v1898_v28 = vadd.f32 %v211_v3, %v198_v13  ;;  %v600_v41 = vsel %vm153_vm1, %v564_v17, %v521_v27  ;;  %v1028_v17 = vadd.f32 %v968_v33, %v1879_v48 }
  0x99   :  { %v1910_v3 = vadd.f32 %v613_v12, %v600_v41  ;;  %v164_v27 = vrot.slane %v1904_v24, 1  ;;  %v981_v13 = vsel %vm153_vm1, %v904_v51, %v980_v14  ;;  %v937_v33 = vrot.slane %v1892_v55, 7 }
  0x9a   :  { %314 = vrot.lane.b32.xlu1 %v1863_v46, %s1467_s2  ;;  %266 = vrot.lane.b32.xlu0 %v1863_v46, %s1468_s21  ;;  %2628 = vst [vmem:[#allocation29_spill] sm:$0xff] %v1885_v37  ;;  %2629 = vst [vmem:[#allocation30_spill] sm:$0xff] %v1898_v28  ;;  %v1916_v46 = vld [vmem:[#allocation7 + $0x58] sm:$0xff]  ;;  %v1922_v41 = vadd.f32 %v1028_v17, %v981_v13  ;;  %v121_v13 = vrot.slane %v1904_v24, 7 }
  0x9b   :  { %2630 = vst [vmem:[#allocation31_spill] sm:$0xff] %v1910_v3  ;;  %v165_v48 = vsel %vm153_vm1, %v85_v54, %v164_v27 }
  0x9e   :  { %716 = vrot.lane.b32.xlu1 %v1873_v45, %s1467_s2  ;;  %668 = vrot.lane.b32.xlu0 %v1873_v45, %s1468_s21  ;;  %v120_v45 = vrot.slane %v66_v40, 7 }
  0xa0   :  { %v150_v42 = vsel %vm104_vm0, %v85_v54, %v120_v45 }
  0xa1   :  { %v212_v12 = vadd.f32 %v150_v42, %v66_v40  ;;  %v938_v40 = vsel %vm104_vm0, %v936_v58, %v937_v33  ;;  %v122_v58 = vsel %vm104_vm0, %v120_v45, %v121_v13 }
  0xa2   :  { %1130 = vrot.lane.b32.xlu1 %v1885_v37, %s1467_s2  ;;  %1082 = vrot.lane.b32.xlu0 %v1885_v37, %s1468_s21  ;;  %v523_v37 = vrot.slane %v470_v61, 7  ;;  %v1029_v5 = vadd.f32 %v938_v40, %v1892_v55  ;;  %v213_v45 = vadd.f32 %v122_v58, %v1904_v24  ;;  %v199_v24 = vsel %vm153_vm1, %v164_v27, %v121_v13 }
  0xa4   :  { %v553_v51 = vsel %vm104_vm0, %v489_v15, %v523_v37 }
  0xa5   :  { %v614_v17 = vadd.f32 %v553_v51, %v470_v61 }
  0xa6   :  { %316 = vrot.lane.b32.xlu1 %v1898_v28, %s1467_s2  ;;  %268 = vrot.lane.b32.xlu0 %v1898_v28, %s1468_s21  ;;  %v566_v28 = vrot.slane %v1916_v46, 1 }
  0xa8   :  { %v567_v54 = vsel %vm153_vm1, %v489_v15, %v566_v28 }
  0xa9   :  { %v1950_v15 = vadd.f32 %v614_v17, %v567_v54  ;;  %v1964_v54 = vld [vmem:[#allocation5 + $0x60] sm:$0xff] }
  0xaa   :  { %718 = vrot.lane.b32.xlu1 %v1910_v3, %s1467_s2  ;;  %670 = vrot.lane.b32.xlu0 %v1910_v3, %s1468_s21  ;;  %v1932_v3 = vadd.f32 %v212_v12, %v165_v48  ;;  %v1943_v48 = vmul.f32 9.0, %v1542_v0  ;;  %v524_v12 = vrot.slane %v1916_v46, 7 }
  0xab   :  { %2632 = vst [vmem:[#allocation33_spill] sm:$0xff] %v1950_v15 }
  0xac   :  { %2631 = vst [vmem:[#allocation32_spill] sm:$0xff] %v1932_v3  ;;  %v525_v58 = vsel %vm104_vm0, %v523_v37, %v524_v12  ;;  %v1995_v37 = vadd.f32 %v213_v45, %v199_v24 }
  0xad   :  { %v615_v13 = vadd.f32 %v525_v58, %v1916_v46 }
  0xae   :  { %1132 = vrot.lane.b32.xlu1 %v1922_v41, %s1467_s2  ;;  %1084 = vrot.lane.b32.xlu0 %v1922_v41, %s1468_s21 }
  0xb0   :  { %v299_v42 = vpop.permute.xlu1 %298  ;;  %v251_v49 = vpop.permute.xlu0 %250 }
  0xb1   :  { %v347_v16 = vsel %vm346_vm2, %v251_v49, %v299_v42  ;;  %v364_v4 = vsel %vm363_vm3, %v251_v49, %v299_v42  ;;  %v1016_v49 = vsel %vm153_vm1, %v980_v14, %v937_v33  ;;  %v1957_v42 = vld [vmem:[#allocation2 + $0x58] sm:$0xff]  ;;  %v1969_v14 = vmul.f32 9.0, %v1544_v1 }
  0xb2   :  { %v380_v61 = vadd.f32 %v347_v16, %v1566_v20  ;;  %318 = vrot.lane.b32.xlu1 %v1932_v3, %s1467_s2  ;;  %270 = vrot.lane.b32.xlu0 %v1932_v3, %s1468_s21  ;;  %v905_v20 = vrot.slane %v1940_v62, 1  ;;  %v2601_v16 = vrot.slane %v1940_v62, 7 }
  0xb4   :  { %v1955_v51 = vadd.f32 %v380_v61, %v364_v4  ;;  %v301_v0 = vpop.permute.xlu1 %300  ;;  %v253_v40 = vpop.permute.xlu0 %252  ;;  %v1976_v61 = vadd.f32 %v1029_v5, %v1016_v49  ;;  %v1988_v5 = vld [vmem:[#allocation7 + $0x60] sm:$0xff]  ;;  %v813_v49 = vmul.f32 9.0, %v1552_v7 }
  0xb5   :  { %v348_v3 = vsel %vm346_vm2, %v253_v40, %v301_v0  ;;  %v365_v17 = vsel %vm363_vm3, %v253_v40, %v301_v0  ;;  %v2603_v0 = vrot.slane %v1957_v42, 1  ;;  %v2604_v40 = vrot.slane %v1964_v54, 7 }
  0xb6   :  { %v428_v4 = vsub.f32 %v1955_v51, %v1943_v48  ;;  %v381_v33 = vadd.f32 %v348_v3, %v1574_v22  ;;  %720 = vrot.lane.b32.xlu1 %v1950_v15, %s1467_s2  ;;  %672 = vrot.lane.b32.xlu0 %v1950_v15, %s1468_s21  ;;  %2633 = vst [vmem:[#allocation34_spill] sm:$0xff] %v1976_v61  ;;  %v86_v3 = vrot.slane %v1964_v54, 1  ;;  %v1986_v15 = vld [vmem:[#allocation5 + $0x68] sm:$0xff]  ;;  %v490_v46 = vrot.slane %v1988_v5, 1 }
  0xb7   :  { %v969_v22 = vsel %vm104_vm0, %v905_v20, %v2601_v16  ;;  %2634 = vst [vmem:[#allocation35_spill] sm:$0xff] %v1986_v15  ;;  %v166_v45 = vrot.slane %v1986_v15, 1 }
  0xb8   :  { %v397_v48 = vadd.f32 %v381_v33, %v365_v17  ;;  %v655_v51 = vpop.permute.xlu1 %654  ;;  %v653_v1 = vpop.permute.xlu0 %652  ;;  %v601_v17 = vsel %vm153_vm1, %v566_v28, %v524_v12  ;;  %v983_v33 = vsel %vm153_vm1, %v905_v20, %v2603_v0 }
  0xba   :  { %v429_v27 = vsub.f32 %v397_v48, %v1969_v14  ;;  %1134 = vrot.lane.b32.xlu1 %v1976_v61, %s1467_s2  ;;  %1086 = vrot.lane.b32.xlu0 %v1976_v61, %s1468_s21  ;;  %v1030_v14 = vadd.f32 %v969_v22, %v1940_v62  ;;  %v151_v61 = vsel %vm104_vm0, %v86_v3, %v2604_v40  ;;  %v812_v22 = vmul.f32 9.0, %v1546_v2 }
  0xbb   :  { %v2021_v40 = vadd.f32 %v615_v13, %v601_v17  ;;  %v167_v2 = vsel %vm153_vm1, %v86_v3, %v166_v45  ;;  %v814_v3 = vmul.f32 9.0, %v1584_v30 }
  0xbc   :  { %v703_v48 = vpop.permute.xlu1 %702  ;;  %v701_v16 = vpop.permute.xlu0 %700 }
  0xbd   :  { %v749_v28 = vsel %vm346_vm2, %v655_v51, %v703_v48  ;;  %v765_v12 = vsel %vm363_vm3, %v655_v51, %v703_v48  ;;  %v748_v20 = vsel %vm346_vm2, %v653_v1, %v701_v16  ;;  %v764_v24 = vsel %vm363_vm3, %v653_v1, %v701_v16 }
  0xbe   :  { %v781_v58 = vadd.f32 %v749_v28, %v1590_v31  ;;  %v780_v0 = vadd.f32 %v748_v20, %v1592_v32  ;;  %320 = vrot.lane.b32.xlu1 %v1995_v37, %s1467_s2  ;;  %272 = vrot.lane.b32.xlu0 %v1995_v37, %s1468_s21  ;;  %v414_v51 = vmul.f32 9.0, %v1568_v21  ;;  %v214_v48 = vadd.f32 %v151_v61, %v1964_v54  ;;  %v2030_v32 = vld [vmem:[#allocation7 + $0x68] sm:$0xff] }
  0xbf   :  { %v2025_v28 = vadd.f32 %v1030_v14, %v983_v33  ;;  %v2636_v21 = vrot.slane %v1988_v5, 7  ;;  %v2044_v14 = vand.u32 2147483647, %v428_v4 }
  0xc0   :  { %v797_v7 = vadd.f32 %v781_v58, %v765_v12  ;;  %v796_v16 = vadd.f32 %v780_v0, %v764_v24  ;;  %v303_v1 = vpop.permute.xlu1 %302  ;;  %v255_v31 = vpop.permute.xlu0 %254  ;;  %v940_v0 = vrot.slane %v1957_v42, 7  ;;  %v2046_v24 = vadd.f32 %v214_v48, %v167_v2 }
  0xc1   :  { %2635 = vst [vmem:[#allocation36_spill] sm:$0xff] %v2025_v28  ;;  %v349_v20 = vsel %vm346_vm2, %v255_v31, %v303_v1  ;;  %v366_v13 = vsel %vm363_vm3, %v255_v31, %v303_v1  ;;  %v554_v61 = vsel %vm104_vm0, %v490_v46, %v2636_v21  ;;  %v568_v58 = vrot.slane %v2030_v32, 1 }
  0xc2   :  { %v829_v17 = vsub.f32 %v797_v7, %v813_v49  ;;  %v828_v12 = vsub.f32 %v796_v16, %v812_v22  ;;  %v382_v33 = vadd.f32 %v349_v20, %v1619_v47  ;;  %722 = vrot.lane.b32.xlu1 %v2021_v40, %s1467_s2  ;;  %674 = vrot.lane.b32.xlu0 %v2021_v40, %s1468_s21  ;;  %v124_v1 = vrot.slane %v1986_v15, 7 }
  0xc3   :  { %2637 = vst [vmem:[#allocation37_spill] sm:$0xff] %v2046_v24  ;;  %v2050_v49 = vand.u32 2147483647, %v429_v27  ;;  %v616_v4 = vadd.f32 %v554_v61, %v1988_v5  ;;  %v2638_v48 = vrot.slane %v1940_v62, 7  ;;  %v569_v61 = vsel %vm153_vm1, %v490_v46, %v568_v58 }
  0xc4   :  { %v2052_v7 = vand.u32 2147483647, %v829_v17  ;;  %v2054_v47 = vand.u32 2147483647, %v828_v12  ;;  %v398_v22 = vadd.f32 %v382_v33, %v366_v13  ;;  %v705_v16 = vpop.permute.xlu1 %704  ;;  %v657_v31 = vpop.permute.xlu0 %656  ;;  %v527_v12 = vrot.slane %v2030_v32, 7 }
  0xc5   :  { %v750_v20 = vsel %vm346_vm2, %v657_v31, %v705_v16  ;;  %v766_v30 = vsel %vm363_vm3, %v657_v31, %v705_v16  ;;  %v941_v2 = vsel %vm104_vm0, %v2638_v48, %v940_v0  ;;  %v2639_v21 = vrot.slane %v1964_v54, 7 }
  0xc6   :  { %v430_v17 = vsub.f32 %v398_v22, %v414_v51  ;;  %v782_v13 = vadd.f32 %v750_v20, %v1630_v53  ;;  %1136 = vrot.lane.b32.xlu1 %v2025_v28, %s1467_s2  ;;  %1088 = vrot.lane.b32.xlu0 %v2025_v28, %s1468_s21  ;;  %v1031_v48 = vadd.f32 %v941_v2, %v1957_v42  ;;  %v2640_v53 = vrot.slane %v1957_v42, 1  ;;  %v2080_v20 = vld [vmem:[#allocation2 + $0x60] sm:$0xff] }
  0xc7   :  { %v125_v51 = vsel %vm104_vm0, %v2639_v21, %v124_v1  ;;  %v1229_v46 = vmul.f32 9.0, %v1602_v39  ;;  %v1228_v2 = vmul.f32 9.0, %v1600_v38  ;;  %v200_v21 = vsel %vm153_vm1, %v166_v45, %v124_v1 }
  0xc8   :  { %v798_v33 = vadd.f32 %v782_v13, %v766_v30  ;;  %v1071_v16 = vpop.permute.xlu1 %1070  ;;  %v1069_v31 = vpop.permute.xlu0 %1068  ;;  %v1017_v22 = vsel %vm153_vm1, %v2640_v53, %v940_v0  ;;  %v2085_v30 = vadd.f32 %v616_v4, %v569_v61  ;;  %v215_v0 = vadd.f32 %v125_v51, %v1986_v15 }
  0xc9   :  { %v2101_v53 = vadd.f32 %v1031_v48, %v1017_v22  ;;  %v906_v38 = vrot.slane %v2080_v20, 1 }
  0xca   :  { %v830_v27 = vsub.f32 %v798_v33, %v814_v3  ;;  %322 = vrot.lane.b32.xlu1 %v2046_v24, %s1467_s2  ;;  %2641 = vst [vmem:[#allocation38_spill] sm:$0xff] %v2085_v30  ;;  %274 = vrot.lane.b32.xlu0 %v2046_v24, %s1468_s21  ;;  %v2642_v3 = vrot.slane %v1988_v5, 7  ;;  %v2097_v33 = vand.u32 2147483647, %v430_v17  ;;  %v2103_v24 = vld [vmem:[#allocation2 + $0x68] sm:$0xff]  ;;  %v2110_v17 = vld [vmem:[#allocation5 + $0x70] sm:$0xff] }
  0xcb   :  { %v87_v28 = vrot.slane %v2110_v17, 1 }
  0xcc   :  { %v528_v13 = vsel %vm104_vm0, %v2642_v3, %v527_v12  ;;  %v2099_v39 = vand.u32 2147483647, %v830_v27  ;;  %v1119_v4 = vpop.permute.xlu1 %1118  ;;  %v1117_v61 = vpop.permute.xlu0 %1116  ;;  %v2127_v27 = vld [vmem:[#allocation5 + $0x78] sm:$0xff] }
  0xcd   :  { %v1165_v45 = vsel %vm346_vm2, %v1071_v16, %v1119_v4  ;;  %v1181_v1 = vsel %vm363_vm3, %v1071_v16, %v1119_v4  ;;  %v1164_v51 = vsel %vm346_vm2, %v1069_v31, %v1117_v61  ;;  %v1180_v3 = vsel %vm363_vm3, %v1069_v31, %v1117_v61 }
  0xce   :  { %v1197_v48 = vadd.f32 %v1165_v45, %v1641_v59  ;;  %v1196_v22 = vadd.f32 %v1164_v51, %v1643_v60  ;;  %724 = vrot.lane.b32.xlu1 %v2085_v30, %s1467_s2  ;;  %676 = vrot.lane.b32.xlu0 %v2085_v30, %s1468_s21  ;;  %v2122_v16 = vmul.f32 9.0, %v1582_v29  ;;  %v602_v31 = vsel %vm153_vm1, %v568_v58, %v527_v12  ;;  %v2131_v30 = vld [vmem:[#allocation7 + $0x70] sm:$0xff] }
  0xcf   :  { %v617_v4 = vadd.f32 %v528_v13, %v2030_v32  ;;  %v815_v12 = vmul.f32 9.0, %v1596_v35  ;;  %v2136_v13 = vadd.f32 %v215_v0, %v200_v21  ;;  %v2644_v35 = vrot.slane %v2103_v24, 1 }
  0xd0   :  { %v1213_v61 = vadd.f32 %v1197_v48, %v1181_v1  ;;  %v1212_v60 = vadd.f32 %v1196_v22, %v1180_v3  ;;  %v305_v45 = vpop.permute.xlu1 %304  ;;  %v257_v51 = vpop.permute.xlu0 %256  ;;  %v2643_v22 = vrot.slane %v2080_v20, 7 }
  0xd1   :  { %v350_v29 = vsel %vm346_vm2, %v257_v51, %v305_v45  ;;  %v367_v58 = vsel %vm363_vm3, %v257_v51, %v305_v45  ;;  %v2146_v59 = vadd.f32 %v617_v4, %v602_v31  ;;  %v985_v21 = vsel %vm153_vm1, %v906_v38, %v2644_v35 }
  0xd2   :  { %v1245_v1 = vsub.f32 %v1213_v61, %v1229_v46  ;;  %v1244_v3 = vsub.f32 %v1212_v60, %v1228_v2  ;;  %v383_v48 = vadd.f32 %v350_v29, %v1666_v11  ;;  %1138 = vrot.lane.b32.xlu1 %v2101_v53, %s1467_s2  ;;  %v970_v15 = vsel %vm104_vm0, %v906_v38, %v2643_v22  ;;  %v2156_v22 = vld [vmem:[#allocation7 + $0x78] sm:$0xff] }
  0xd3   :  { %1090 = vrot.lane.b32.xlu0 %v2101_v53, %s1468_s21  ;;  %v491_v11 = vrot.slane %v2131_v30, 1  ;;  %v2645_v51 = vrot.slane %v2110_v17, 7  ;;  %v1032_v38 = vadd.f32 %v970_v15, %v2080_v20  ;;  %v529_v35 = vrot.slane %v2131_v30, 7 }
  0xd4   :  { %v1261_v2 = vand.u32 2147483647, %v1245_v1  ;;  %v1260_v0 = vand.u32 2147483647, %v1244_v3  ;;  %v399_v61 = vadd.f32 %v383_v48, %v367_v58  ;;  %v707_v60 = vpop.permute.xlu1 %706  ;;  %v659_v45 = vpop.permute.xlu0 %658  ;;  %v2646_v1 = vmax.f32.f32 %v2050_v49, %v2052_v7 }
  0xd5   :  { %v152_v29 = vsel %vm104_vm0, %v87_v28, %v2645_v51  ;;  %v751_v31 = vsel %vm346_vm2, %v659_v45, %v707_v60  ;;  %v767_v4 = vsel %vm363_vm3, %v659_v45, %v707_v60  ;;  %v2647_v3 = vmax.f32.f32 %v2044_v14, %v2054_v47 }
  0xd6   :  { %v1277_v58 = vsub.f32 %v2646_v1, %v1261_v2  ;;  %v431_v51 = vsub.f32 %v399_v61, %v2122_v16  ;;  %v783_v46 = vadd.f32 %v751_v31, %v1682_v23  ;;  %324 = vrot.lane.b32.xlu1 %v2136_v13, %s1467_s2  ;;  %v1230_v15 = vmul.f32 9.0, %v1647_v63 }
  0xd7   :  { %v1276_v48 = vsub.f32 %v2647_v3, %v1260_v0  ;;  %276 = vrot.lane.b32.xlu0 %v2136_v13, %s1468_s21  ;;  %v2648_v60 = vrot.slane %v2127_v27, 1  ;;  %v216_v7 = vadd.f32 %v152_v29, %v2110_v17  ;;  %v570_v14 = vrot.slane %v2156_v22, 1 }
  0xd8   :  { %v1293_v47 = vand.u32 2147483647, %v1277_v58  ;;  %v799_v2 = vadd.f32 %v783_v46, %v767_v4  ;;  %v1121_v23 = vpop.permute.xlu1 %1120  ;;  %v1073_v0 = vpop.permute.xlu0 %1072  ;;  %v943_v61 = vrot.slane %v2103_v24, 7  ;;  %v2183_v63 = vadd.f32 %v1032_v38, %v985_v21 }
  0xd9   :  { %v169_v49 = vsel %vm153_vm1, %v87_v28, %v2648_v60  ;;  %v1292_v16 = vand.u32 2147483647, %v1276_v48  ;;  %v1166_v45 = vsel %vm346_vm2, %v1073_v0, %v1121_v23  ;;  %v1182_v31 = vsel %vm363_vm3, %v1073_v0, %v1121_v23 }
  0xda   :  { %v555_v28 = vsel %vm104_vm0, %v491_v11, %v529_v35  ;;  %v1310_v29 = vsel %vm1308_vm4, %v1293_v47, 0.0  ;;  %v831_v58 = vsub.f32 %v799_v2, %v815_v12  ;;  %v1198_v46 = vadd.f32 %v1166_v45, %v1696_v36  ;;  %726 = vrot.lane.b32.xlu1 %v2146_v59, %s1467_s2 }
  0xdb   :  { %v1309_v1 = vsel %vm1308_vm4, %v1292_v16, 0.0  ;;  %678 = vrot.lane.b32.xlu0 %v2146_v59, %s1468_s21  ;;  %v416_v21 = vmul.f32 9.0, %v1660_v10  ;;  %v127_v38 = vrot.slane %v2127_v27, 7  ;;  %v2197_v3 = vand.u32 2147483647, %v431_v51 }
  0xdc   :  { %v1311_v4 = vadd.f32 %v1310_v29, %v1309_v1  ;;  %v2199_v48 = vand.u32 2147483647, %v831_v58  ;;  %v1214_v60 = vadd.f32 %v1198_v46, %v1182_v31  ;;  %v307_v47 = vpop.permute.xlu1 %306  ;;  %v259_v12 = vpop.permute.xlu0 %258  ;;  %v2201_v16 = vadd.f32 %v216_v7, %v169_v49 }
  0xdd   :  { %v351_v36 = vsel %vm346_vm2, %v259_v12, %v307_v47  ;;  %v368_v2 = vsel %vm363_vm3, %v259_v12, %v307_v47  ;;  %v618_v23 = vadd.f32 %v555_v28, %v2131_v30  ;;  %v2649_v0 = vrot.slane %v2080_v20, 7 }
  0xde   :  { %v863_v51 = vmax.f32.f32 %v2197_v3, %v2199_v48  ;;  %v1246_v45 = vsub.f32 %v1214_v60, %v1230_v15  ;;  %v384_v31 = vadd.f32 %v351_v36, %v1707_v44  ;;  %1140 = vrot.lane.b32.xlu1 %v2183_v63, %s1467_s2  ;;  %v571_v49 = vsel %vm153_vm1, %v491_v11, %v570_v14 }
  0xdf   :  { %v944_v10 = vsel %vm104_vm0, %v2649_v0, %v943_v61  ;;  %1092 = vrot.lane.b32.xlu0 %v2183_v63, %s1468_s21  ;;  %v816_v7 = vmul.f32 9.0, %v1676_v19  ;;  %v2650_v15 = vrot.slane %v2103_v24, 1  ;;  %v2226_v11 = vadd.f32 %v618_v23, %v571_v49 }
  0xe0   :  { %v1262_v28 = vand.u32 2147483647, %v1246_v45  ;;  %v400_v29 = vadd.f32 %v384_v31, %v368_v2  ;;  %v709_v1 = vpop.permute.xlu1 %708  ;;  %v661_v58 = vpop.permute.xlu0 %660  ;;  %v1033_v46 = vadd.f32 %v944_v10, %v2103_v24  ;;  %v2651_v12 = vrot.slane %v2110_v17, 7  ;;  %v2238_v10 = vld [vmem:[#allocation2 + $0x70] sm:$0xff] }
  0xe1   :  { %v1018_v44 = vsel %vm153_vm1, %v2650_v15, %v943_v61  ;;  %v752_v60 = vsel %vm346_vm2, %v661_v58, %v709_v1  ;;  %v768_v47 = vsel %vm363_vm3, %v661_v58, %v709_v1  ;;  %v2652_v36 = vmax.f32.f32 %v2097_v33, %v2099_v39 }
  0xe2   :  { %v128_v19 = vsel %vm104_vm0, %v2651_v12, %v127_v38  ;;  %v432_v0 = vsub.f32 %v400_v29, %v416_v21  ;;  %v784_v45 = vadd.f32 %v752_v60, %v1717_v50  ;;  %326 = vrot.lane.b32.xlu1 %v2201_v16, %s1467_s2  ;;  %v530_v61 = vrot.slane %v2156_v22, 7 }
  0xe3   :  { %v1278_v2 = vsub.f32 %v2652_v36, %v1262_v28  ;;  %278 = vrot.lane.b32.xlu0 %v2201_v16, %s1468_s21  ;;  %v1231_v23 = vmul.f32 9.0, %v1656_v6  ;;  %v2653_v31 = vrot.slane %v2127_v27, 1  ;;  %v2246_v28 = vadd.f32 %v1033_v46, %v1018_v44  ;;  %v2260_v46 = vld [vmem:[#allocation2 + $0x78] sm:$0xff] }
  0xe4   :  { %v800_v21 = vadd.f32 %v784_v45, %v768_v47  ;;  %v1123_v49 = vpop.permute.xlu1 %1122  ;;  %v1075_v50 = vpop.permute.xlu0 %1074  ;;  %v217_v29 = vadd.f32 %v128_v19, %v2127_v27  ;;  %v907_v15 = vrot.slane %v2238_v10, 1  ;;  %v945_v6 = vrot.slane %v2238_v10, 7  ;;  %2654 = vst [vmem:[#allocation39_spill] sm:$0xff] %v2260_v46 }
  0xe5   :  { %v201_v33 = vsel %vm153_vm1, %v2653_v31, %v127_v38  ;;  %v1294_v39 = vand.u32 2147483647, %v1278_v2  ;;  %v1167_v1 = vsel %vm346_vm2, %v1075_v50, %v1123_v49  ;;  %v1183_v58 = vsel %vm363_vm3, %v1075_v50, %v1123_v49 }
  0xe6   :  { %v832_v12 = vsub.f32 %v800_v21, %v816_v7  ;;  %v1199_v38 = vadd.f32 %v1167_v1, %v1729_v57  ;;  %728 = vrot.lane.b32.xlu1 %v2226_v11, %s1467_s2  ;;  %v531_v44 = vsel %vm104_vm0, %v529_v35, %v530_v61  ;;  %v417_v19 = vmul.f32 9.0, %v1674_v18 }
  0xe7   :  { %v1312_v60 = vsel %vm1308_vm4, %v1294_v39, 0.0  ;;  %680 = vrot.lane.b32.xlu0 %v2226_v11, %s1468_s21  ;;  %v2265_v36 = vand.u32 2147483647, %v432_v0  ;;  %v2269_v31 = vadd.f32 %v217_v29, %v201_v33  ;;  %v986_v21 = vrot.slane %v2260_v46, 1 }
  0xe8   :  { %v1313_v47 = vadd.f32 %v1312_v60, %v1311_v4  ;;  %v2267_v7 = vand.u32 2147483647, %v832_v12  ;;  %v1215_v57 = vadd.f32 %v1199_v38, %v1183_v58  ;;  %v309_v2 = vpop.permute.xlu1 %308  ;;  %v261_v45 = vpop.permute.xlu0 %260  ;;  %v619_v4 = vadd.f32 %v531_v44, %v2156_v22 }
  0xe9   :  { %v352_v39 = vsel %vm346_vm2, %v261_v45, %v309_v2  ;;  %v369_v35 = vsel %vm363_vm3, %v261_v45, %v309_v2  ;;  %v971_v33 = vsel %vm104_vm0, %v907_v15, %v945_v6  ;;  %v603_v50 = vsel %vm153_vm1, %v570_v14, %v530_v61 }
  0xea   :  { %v864_v18 = vmax.f32.f32 %v2265_v36, %v2267_v7  ;;  %v1247_v0 = vsub.f32 %v1215_v57, %v1231_v23  ;;  %v385_v49 = vadd.f32 %v352_v39, %v1744_v9  ;;  %1142 = vrot.lane.b32.xlu1 %v2246_v28, %s1467_s2  ;;  %v946_v29 = vrot.slane %v2260_v46, 7 }
  0xeb   :  { %1094 = vrot.lane.b32.xlu0 %v2246_v28, %s1468_s21  ;;  %v817_v23 = vmul.f32 9.0, %v1690_v34  ;;  %v987_v44 = vsel %vm153_vm1, %v907_v15, %v986_v21  ;;  %v1034_v36 = vadd.f32 %v971_v33, %v2238_v10  ;;  %v2298_v34 = vadd.f32 %v619_v4, %v603_v50 }
  0xec   :  { %v1263_v1 = vand.u32 2147483647, %v1247_v0  ;;  %v401_v58 = vadd.f32 %v385_v49, %v369_v35  ;;  %v711_v60 = vpop.permute.xlu1 %710  ;;  %v663_v9 = vpop.permute.xlu0 %662  ;;  %v947_v57 = vsel %vm104_vm0, %v945_v6, %v946_v29  ;;  %v1232_v3 = vmul.f32 9.0, %v1723_v56 }
  0xed   :  { %v753_v12 = vsel %vm346_vm2, %v663_v9, %v711_v60  ;;  %v769_v38 = vsel %vm363_vm3, %v663_v9, %v711_v60  ;;  %v1035_v6 = vadd.f32 %v947_v57, %v2260_v46  ;;  %v1019_v56 = vsel %vm153_vm1, %v986_v21, %v946_v29  ;;  %v2656_v57 = vld [vmem:[#allocation15_spill] sm:$0xff] }
  0xee   :  { %v1279_v14 = vsub.f32 %v863_v51, %v1263_v1  ;;  %v433_v61 = vsub.f32 %v401_v58, %v417_v19  ;;  %v785_v7 = vadd.f32 %v753_v12, %v1760_v26  ;;  %328 = vrot.lane.b32.xlu1 %v2269_v31, %s1467_s2  ;;  %v2306_v51 = vadd.f32 %v1034_v36, %v987_v44 }
  0xef   :  { %280 = vrot.lane.b32.xlu0 %v2269_v31, %s1468_s21  ;;  %v418_v60 = vmul.f32 9.0, %v1738_v8 }
  0xf0   :  { %v1295_v15 = vand.u32 2147483647, %v1279_v14  ;;  %v801_v2 = vadd.f32 %v785_v7, %v769_v38  ;;  %v1125_v45 = vpop.permute.xlu1 %1124  ;;  %v1077_v39 = vpop.permute.xlu0 %1076  ;;  %v449_v49 = vand.u32 2147483647, %v433_v61  ;;  %v2322_v38 = vadd.f32 %v1035_v6, %v1019_v56 }
  0xf1   :  { %v1168_v48 = vsel %vm346_vm2, %v1077_v39, %v1125_v45  ;;  %v1184_v26 = vsel %vm363_vm3, %v1077_v39, %v1125_v45 }
  0xf2   :  { %v1314_v19 = vsel %vm1308_vm4, %v1295_v15, 0.0  ;;  %v833_v35 = vsub.f32 %v801_v2, %v817_v23  ;;  %v1200_v4 = vadd.f32 %v1168_v48, %v1774_v43  ;;  %730 = vrot.lane.b32.xlu1 %v2298_v34, %s1467_s2  ;;  %2655 = vst [vmem:[#allocation40_spill] sm:$0xff] %v2322_v38 }
  0xf3   :  { %v1315_v0 = vadd.f32 %v1314_v19, %v1313_v47  ;;  %682 = vrot.lane.b32.xlu0 %v2298_v34, %s1468_s21 }
  0xf4   :  { %v849_v33 = vand.u32 2147483647, %v833_v35  ;;  %v1216_v50 = vadd.f32 %v1200_v4, %v1184_v26  ;;  %v311_v1 = vpop.permute.xlu1 %310  ;;  %v263_v58 = vpop.permute.xlu0 %262  ;;  %v2658_v4 = vld [vmem:[#allocation17_spill] sm:$0xff] }
  0xf5   :  { %v353_v43 = vsel %vm346_vm2, %v263_v58, %v311_v1  ;;  %v370_v23 = vsel %vm363_vm3, %v263_v58, %v311_v1 }
  0xf6   :  { %v865_v9 = vmax.f32.f32 %v449_v49, %v849_v33  ;;  %v1248_v12 = vsub.f32 %v1216_v50, %v1232_v3  ;;  %v386_v47 = vadd.f32 %v353_v43, %v1785_v52  ;;  %1144 = vrot.lane.b32.xlu1 %v2306_v51, %s1467_s2  ;;  %v818_v52 = vmul.f32 9.0, %v1754_v25  ;;  %v2657_v25 = vld [vmem:[#allocation12_spill] sm:$0xff] }
  0xf7   :  { %1096 = vrot.lane.b32.xlu0 %v2306_v51, %s1468_s21  ;;  %v1233_v35 = vmul.f32 9.0, %v2657_v25 }
  0xf8   :  { %v1264_v21 = vand.u32 2147483647, %v1248_v12  ;;  %v402_v29 = vadd.f32 %v386_v47, %v370_v23  ;;  %v713_v44 = vpop.permute.xlu1 %712  ;;  %v665_v8 = vpop.permute.xlu0 %664  ;;  %v2659_v47 = vld [vmem:[#allocation13_spill] sm:$0xff] }
  0xf9   :  { %v754_v36 = vsel %vm346_vm2, %v665_v8, %v713_v44  ;;  %v770_v14 = vsel %vm363_vm3, %v665_v8, %v713_v44 }
  0xfa   :  { %v1280_v61 = vsub.f32 %v864_v18, %v1264_v21  ;;  %v434_v7 = vsub.f32 %v402_v29, %v418_v60  ;;  %v786_v15 = vadd.f32 %v754_v36, %v2656_v57  ;;  %1146 = vrot.lane.b32.xlu1 %v2322_v38, %s1467_s2  ;;  %v419_v21 = vmul.f32 9.0, %v2659_v47  ;;  %v2660_v29 = vld [vmem:[#allocation20_spill] sm:$0xff] }
  0xfb   :  { %1098 = vrot.lane.b32.xlu0 %v2322_v38, %s1468_s21 }
  0xfc   :  { %v1296_v2 = vand.u32 2147483647, %v1280_v61  ;;  %v802_v45 = vadd.f32 %v786_v15, %v770_v14  ;;  %v1127_v39 = vpop.permute.xlu1 %1126  ;;  %v1079_v3 = vpop.permute.xlu0 %1078  ;;  %v450_v49 = vand.u32 2147483647, %v434_v7  ;;  %v2661_v15 = vld [vmem:[#allocation14_spill] sm:$0xff] }
  0xfd   :  { %v1169_v48 = vsel %vm346_vm2, %v1079_v3, %v1127_v39  ;;  %v1185_v26 = vsel %vm363_vm3, %v1079_v3, %v1127_v39 }
  0xfe   :  { %v1316_v18 = vsel %vm1308_vm4, %v1296_v2, 0.0  ;;  %v834_v19 = vsub.f32 %v802_v45, %v818_v52  ;;  %v1201_v6 = vadd.f32 %v1169_v48, %v2658_v4  ;;  %v819_v2 = vmul.f32 9.0, %v2661_v15  ;;  %v2662_v45 = vld [vmem:[#allocation23_spill] sm:$0xff] }
  0xff   :  { %v1317_v56 = vadd.f32 %v1316_v18, %v1315_v0 }
 0x100   :  { %v850_v33 = vand.u32 2147483647, %v834_v19  ;;  %v1217_v50 = vadd.f32 %v1201_v6, %v1185_v26  ;;  %v313_v1 = vpop.permute.xlu1 %312  ;;  %v265_v58 = vpop.permute.xlu0 %264  ;;  %v2663_v6 = vld [vmem:[#allocation16_spill] sm:$0xff] }
 0x101   :  { %v354_v60 = vsel %vm346_vm2, %v265_v58, %v313_v1  ;;  %v371_v43 = vsel %vm363_vm3, %v265_v58, %v313_v1 }
 0x102   :  { %v866_v23 = vmax.f32.f32 %v450_v49, %v850_v33  ;;  %v1249_v12 = vsub.f32 %v1217_v50, %v1233_v35  ;;  %v387_v44 = vadd.f32 %v354_v60, %v2660_v29  ;;  %v1234_v49 = vmul.f32 9.0, %v2663_v6  ;;  %v2664_v33 = vld [vmem:[#allocation25_spill] sm:$0xff] }
 0x104   :  { %v1265_v8 = vand.u32 2147483647, %v1249_v12  ;;  %v403_v36 = vadd.f32 %v387_v44, %v371_v43  ;;  %v715_v14 = vpop.permute.xlu1 %714  ;;  %v667_v61 = vpop.permute.xlu0 %666 }
 0x105   :  { %v755_v0 = vsel %vm346_vm2, %v667_v61, %v715_v14  ;;  %v771_v7 = vsel %vm363_vm3, %v667_v61, %v715_v14  ;;  %v2666_v14 = vld [vmem:[#allocation26_spill] sm:$0xff] }
 0x106   :  { %v1281_v52 = vsub.f32 %v865_v9, %v1265_v8  ;;  %v435_v57 = vsub.f32 %v403_v36, %v419_v21  ;;  %v787_v39 = vadd.f32 %v755_v0, %v2662_v45  ;;  %v2665_v8 = vld [vmem:[#allocation19_spill] sm:$0xff] }
 0x107   :  { %v420_v36 = vmul.f32 9.0, %v2665_v8 }
 0x108   :  { %v1297_v3 = vand.u32 2147483647, %v1281_v52  ;;  %v803_v48 = vadd.f32 %v787_v39, %v771_v7  ;;  %v1129_v26 = vpop.permute.xlu1 %1128  ;;  %v1081_v18 = vpop.permute.xlu0 %1080  ;;  %v451_v1 = vand.u32 2147483647, %v435_v57  ;;  %v2667_v39 = vld [vmem:[#allocation22_spill] sm:$0xff] }
 0x109   :  { %v1170_v19 = vsel %vm346_vm2, %v1081_v18, %v1129_v26  ;;  %v1186_v25 = vsel %vm363_vm3, %v1081_v18, %v1129_v26 }
 0x10a   :  { %v1318_v35 = vsel %vm1308_vm4, %v1297_v3, 0.0  ;;  %v835_v4 = vsub.f32 %v803_v48, %v819_v2  ;;  %v1202_v9 = vadd.f32 %v1170_v19, %v2664_v33  ;;  %v820_v3 = vmul.f32 9.0, %v2667_v39  ;;  %v2668_v48 = vld [vmem:[#allocation27_spill] sm:$0xff] }
 0x10b   :  { %v1319_v50 = vadd.f32 %v1318_v35, %v1317_v56 }
 0x10c   :  { %v851_v58 = vand.u32 2147483647, %v835_v4  ;;  %v1218_v60 = vadd.f32 %v1202_v9, %v1186_v25  ;;  %v315_v43 = vpop.permute.xlu1 %314  ;;  %v267_v12 = vpop.permute.xlu0 %266  ;;  %v2669_v9 = vld [vmem:[#allocation18_spill] sm:$0xff] }
 0x10d   :  { %v355_v47 = vsel %vm346_vm2, %v267_v12, %v315_v43  ;;  %v372_v21 = vsel %vm363_vm3, %v267_v12, %v315_v43 }
 0x10e   :  { %v867_v29 = vmax.f32.f32 %v451_v1, %v851_v58  ;;  %v1250_v44 = vsub.f32 %v1218_v60, %v1234_v49  ;;  %v388_v61 = vadd.f32 %v355_v47, %v2666_v14  ;;  %v1235_v1 = vmul.f32 9.0, %v2669_v9  ;;  %v2670_v58 = vld [vmem:[#allocation29_spill] sm:$0xff] }
 0x110   :  { %v1266_v0 = vand.u32 2147483647, %v1250_v44  ;;  %v404_v7 = vadd.f32 %v388_v61, %v372_v21  ;;  %v717_v52 = vpop.permute.xlu1 %716  ;;  %v669_v15 = vpop.permute.xlu0 %668 }
 0x111   :  { %v756_v56 = vsel %vm346_vm2, %v669_v15, %v717_v52  ;;  %v772_v57 = vsel %vm363_vm3, %v669_v15, %v717_v52  ;;  %v2672_v15 = vld [vmem:[#allocation21_spill] sm:$0xff] }
 0x112   :  { %v1282_v2 = vsub.f32 %v866_v23, %v1266_v0  ;;  %v436_v45 = vsub.f32 %v404_v7, %v420_v36  ;;  %v788_v26 = vadd.f32 %v756_v56, %v2668_v48  ;;  %v2671_v0 = vld [vmem:[#allocation30_spill] sm:$0xff]  ;;  %v421_v56 = vmul.f32 9.0, %v2672_v15  ;;  %v2673_v48 = vld [vmem:[#allocation24_spill] sm:$0xff] }
 0x114   :  { %v1298_v18 = vand.u32 2147483647, %v1282_v2  ;;  %v804_v19 = vadd.f32 %v788_v26, %v772_v57  ;;  %v1131_v25 = vpop.permute.xlu1 %1130  ;;  %v1083_v35 = vpop.permute.xlu0 %1082  ;;  %v452_v43 = vand.u32 2147483647, %v436_v45  ;;  %v821_v26 = vmul.f32 9.0, %v2673_v48 }
 0x115   :  { %v1171_v4 = vsel %vm346_vm2, %v1083_v35, %v1131_v25  ;;  %v1187_v6 = vsel %vm363_vm3, %v1083_v35, %v1131_v25 }
 0x116   :  { %v1320_v49 = vsel %vm1308_vm4, %v1298_v18, 0.0  ;;  %v836_v33 = vsub.f32 %v804_v19, %v820_v3  ;;  %v1203_v23 = vadd.f32 %v1171_v4, %v2670_v58  ;;  %v2674_v18 = vld [vmem:[#allocation31_spill] sm:$0xff] }
 0x117   :  { %v1321_v60 = vadd.f32 %v1320_v49, %v1319_v50 }
 0x118   :  { %v852_v12 = vand.u32 2147483647, %v836_v33  ;;  %v1219_v47 = vadd.f32 %v1203_v23, %v1187_v6  ;;  %v317_v21 = vpop.permute.xlu1 %316  ;;  %v269_v44 = vpop.permute.xlu0 %268  ;;  %v2675_v23 = vld [vmem:[#allocation28_spill] sm:$0xff] }
 0x119   :  { %v356_v8 = vsel %vm346_vm2, %v269_v44, %v317_v21  ;;  %v373_v36 = vsel %vm363_vm3, %v269_v44, %v317_v21 }
 0x11a   :  { %v868_v14 = vmax.f32.f32 %v452_v43, %v852_v12  ;;  %v1251_v61 = vsub.f32 %v1219_v47, %v1235_v1  ;;  %v389_v7 = vadd.f32 %v356_v8, %v2671_v0  ;;  %v1236_v43 = vmul.f32 9.0, %v2675_v23 }
 0x11c   :  { %v1267_v52 = vand.u32 2147483647, %v1251_v61  ;;  %v405_v57 = vadd.f32 %v389_v7, %v373_v36  ;;  %v719_v2 = vpop.permute.xlu1 %718  ;;  %v671_v39 = vpop.permute.xlu0 %670 }
 0x11d   :  { %v757_v50 = vsel %vm346_vm2, %v671_v39, %v719_v2  ;;  %v773_v45 = vsel %vm363_vm3, %v671_v39, %v719_v2 }
 0x11e   :  { %v1283_v3 = vsub.f32 %v867_v29, %v1267_v52  ;;  %v789_v19 = vadd.f32 %v757_v50, %v2674_v18  ;;  %v437_v35 = vsub.f32 %v405_v57, %v421_v56 }
 0x120   :  { %v1299_v25 = vand.u32 2147483647, %v1283_v3  ;;  %v805_v4 = vadd.f32 %v789_v19, %v773_v45  ;;  %v1133_v6 = vpop.permute.xlu1 %1132  ;;  %v1085_v49 = vpop.permute.xlu0 %1084  ;;  %v453_v47 = vand.u32 2147483647, %v437_v35  ;;  %v2676_v45 = vld [vmem:[#allocation34_spill] sm:$0xff] }
 0x121   :  { %v1172_v33 = vsel %vm346_vm2, %v1085_v49, %v1133_v6  ;;  %v1188_v9 = vsel %vm363_vm3, %v1085_v49, %v1133_v6 }
 0x122   :  { %v1322_v1 = vsel %vm1308_vm4, %v1299_v25, 0.0  ;;  %v837_v58 = vsub.f32 %v805_v4, %v821_v26  ;;  %v1204_v29 = vadd.f32 %v1172_v33, %v1922_v41 }
 0x123   :  { %v1323_v12 = vadd.f32 %v1322_v1, %v1321_v60  ;;  %v1237_v60 = vmul.f32 9.0, %v1892_v55 }
 0x124   :  { %v853_v21 = vand.u32 2147483647, %v837_v58  ;;  %v1220_v44 = vadd.f32 %v1204_v29, %v1188_v9  ;;  %v2378_v8 = vpop.permute.xlu1 %318  ;;  %v2380_v36 = vpop.permute.xlu0 %270 }
 0x126   :  { %v869_v61 = vmax.f32.f32 %v453_v47, %v853_v21  ;;  %v1252_v0 = vsub.f32 %v1220_v44, %v1236_v43 }
 0x128   :  { %v1268_v7 = vand.u32 2147483647, %v1252_v0  ;;  %v721_v52 = vpop.permute.xlu1 %720  ;;  %v673_v15 = vpop.permute.xlu0 %672 }
 0x129   :  { %v758_v0 = vsel %vm346_vm2, %v673_v15, %v721_v52 }
 0x12a   :  { %v1284_v56 = vsub.f32 %v868_v14, %v1268_v7 }
 0x12c   :  { %v1300_v57 = vand.u32 2147483647, %v1284_v56  ;;  %v1135_v2 = vpop.permute.xlu1 %1134  ;;  %v1087_v39 = vpop.permute.xlu0 %1086 }
 0x12d   :  { %v1173_v50 = vsel %vm346_vm2, %v1087_v39, %v1135_v2  ;;  %v1189_v26 = vsel %vm363_vm3, %v1087_v39, %v1135_v2  ;;  %v2678_v2 = vld [vmem:[#allocation33_spill] sm:$0xff] }
 0x12e   :  { %v1324_v41 = vsel %vm1308_vm4, %v1300_v57, 0.0  ;;  %v1205_v3 = vadd.f32 %v1173_v50, %v2676_v45  ;;  %v790_v39 = vadd.f32 %v758_v0, %v2678_v2  ;;  %v357_v50 = vsel %vm346_vm2, %v2380_v36, %v2378_v8  ;;  %v2679_v2 = vld [vmem:[#allocation32_spill] sm:$0xff] }
 0x12f   :  { %v1325_v48 = vadd.f32 %v1324_v41, %v1323_v12  ;;  %v2426_v0 = vmul.f32 9.0, %v1940_v62  ;;  %v2439_v62 = vmul.f32 9.0, %v1957_v42  ;;  %v2681_v42 = vld [vmem:[#allocation36_spill] sm:$0xff] }
 0x130   :  { %v1221_v18 = vadd.f32 %v1205_v3, %v1189_v26  ;;  %v321_v19 = vpop.permute.xlu1 %320  ;;  %v273_v25 = vpop.permute.xlu0 %272  ;;  %v1377_v3 = vld [vmem:[#allocation7 + $0x50] sm:$0xff]  ;;  %v1378_v26 = vld [vmem:[#allocation5 + $0x58] sm:$0xff] }
 0x132   :  { %v1253_v35 = vsub.f32 %v1221_v18, %v1237_v60  ;;  %v1376_v60 = vld [vmem:[#allocation5 + $0x50] sm:$0xff]  ;;  %v2419_v18 = vmul.f32 9.0, %v1378_v26 }
 0x133   :  { %v2417_v45 = vmul.f32 9.0, %v1376_v60  ;;  %v390_v60 = vadd.f32 %v357_v50, %v2679_v2  ;;  %v2475_v2 = vmul.f32 9.0, %v2103_v24  ;;  %v2489_v24 = vmul.f32 9.0, %v2156_v22 }
 0x134   :  { %v1269_v4 = vand.u32 2147483647, %v1253_v35  ;;  %v723_v14 = vpop.permute.xlu1 %722  ;;  %v675_v6 = vpop.permute.xlu0 %674  ;;  %v358_v35 = vsel %vm346_vm2, %v273_v25, %v321_v19 }
 0x135   :  { %v759_v7 = vsel %vm346_vm2, %v675_v6, %v723_v14  ;;  %v775_v26 = vsel %vm363_vm3, %v675_v6, %v723_v14  ;;  %v391_v38 = vadd.f32 %v358_v35, %v1995_v37  ;;  %v2453_v37 = vmul.f32 9.0, %v2110_v17 }
 0x136   :  { %v1285_v49 = vsub.f32 %v869_v61, %v1269_v4  ;;  %v791_v41 = vadd.f32 %v759_v7, %v2021_v40  ;;  %v2429_v40 = vmul.f32 9.0, %v1964_v54  ;;  %v375_v17 = vsel %vm363_vm3, %v273_v25, %v321_v19 }
 0x138   :  { %v1301_v33 = vand.u32 2147483647, %v1285_v49  ;;  %v1137_v9 = vpop.permute.xlu1 %1136  ;;  %v1089_v1 = vpop.permute.xlu0 %1088  ;;  %v774_v49 = vsel %vm363_vm3, %v673_v15, %v721_v52  ;;  %v807_v46 = vadd.f32 %v791_v41, %v775_v26  ;;  %v2436_v52 = vmul.f32 9.0, %v1988_v5  ;;  %v2680_v15 = vld [vmem:[#allocation35_spill] sm:$0xff] }
 0x139   :  { %v2442_v54 = vmul.f32 9.0, %v2680_v15  ;;  %v374_v5 = vsel %vm363_vm3, %v2380_v36, %v2378_v8  ;;  %v407_v8 = vadd.f32 %v391_v38, %v375_v17  ;;  %v2486_v26 = vmul.f32 9.0, %v2127_v27 }
 0x13a   :  { %v1326_v58 = vsel %vm1308_vm4, %v1301_v33, 0.0  ;;  %v1379_v33 = vld [vmem:[#allocation7 + $0x58] sm:$0xff]  ;;  %v406_v41 = vadd.f32 %v390_v60, %v374_v5 }
 0x13b   :  { %v2388_v23 = vadd.f32 %v1326_v58, %v1325_v48  ;;  %v822_v48 = vmul.f32 9.0, %v1377_v3  ;;  %v823_v58 = vmul.f32 9.0, %v1379_v33  ;;  %v806_v3 = vadd.f32 %v790_v39, %v774_v49 }
 0x13c   :  { %v2390_v55 = vpop.permute.xlu1 %322  ;;  %v2392_v43 = vpop.permute.xlu0 %274  ;;  %v2445_v33 = vmul.f32 9.0, %v2030_v32  ;;  %v2448_v39 = vmul.f32 9.0, %v2080_v20  ;;  %v2465_v20 = vmul.f32 9.0, %v2131_v30  ;;  %v1190_v30 = vsel %vm363_vm3, %v1089_v1, %v1137_v9 }
 0x13d   :  { %2677 = vst [vmem:[#allocation15_spill] sm:$0xff] %v2388_v23  ;;  %v1174_v23 = vsel %vm346_vm2, %v1089_v1, %v1137_v9  ;;  %v838_v35 = vsub.f32 %v806_v3, %v822_v48  ;;  %v839_v36 = vsub.f32 %v807_v46, %v823_v58  ;;  %v2682_v48 = vld [vmem:[#allocation38_spill] sm:$0xff]  ;;  %v2683_v1 = vld [vmem:[#allocation37_spill] sm:$0xff] }
 0x13e   :  { %v1206_v6 = vadd.f32 %v1174_v23, %v2681_v42  ;;  %v359_v23 = vsel %vm346_vm2, %v2392_v43, %v2390_v55  ;;  %v439_v42 = vsub.f32 %v407_v8, %v2419_v18 }
 0x13f   :  { %v854_v9 = vand.u32 2147483647, %v838_v35  ;;  %v392_v15 = vadd.f32 %v359_v23, %v2683_v1 }
 0x140   :  { %v2394_v29 = vpop.permute.xlu1 %724  ;;  %v2396_v12 = vpop.permute.xlu0 %676  ;;  %v1222_v46 = vadd.f32 %v1206_v6, %v1190_v30 }
 0x141   :  { %v760_v49 = vsel %vm346_vm2, %v2396_v12, %v2394_v29 }
 0x142   :  { %v792_v58 = vadd.f32 %v760_v49, %v2682_v48  ;;  %v1254_v18 = vsub.f32 %v1222_v46, %v2426_v0  ;;  %v455_v46 = vand.u32 2147483647, %v439_v42 }
 0x144   :  { %v2398_v47 = vpop.permute.xlu1 %1138  ;;  %v1270_v48 = vand.u32 2147483647, %v1254_v18 }
 0x145   :  { %v2400_v21 = vpop.permute.xlu0 %1090 }
 0x146   :  { %v1175_v50 = vsel %vm346_vm2, %v2400_v21, %v2398_v47  ;;  %v1191_v6 = vsel %vm363_vm3, %v2400_v21, %v2398_v47 }
 0x147   :  { %v1207_v60 = vadd.f32 %v1175_v50, %v2101_v53  ;;  %v438_v53 = vsub.f32 %v406_v41, %v2417_v45  ;;  %v855_v50 = vand.u32 2147483647, %v839_v36  ;;  %v376_v45 = vsel %vm363_vm3, %v2392_v43, %v2390_v55 }
 0x148   :  { %v2402_v44 = vpop.permute.xlu1 %324  ;;  %v776_v41 = vsel %vm363_vm3, %v2396_v12, %v2394_v29 }
 0x149   :  { %v2404_v61 = vpop.permute.xlu0 %276  ;;  %v1223_v35 = vadd.f32 %v1207_v60, %v1191_v6  ;;  %v808_v49 = vadd.f32 %v792_v58, %v776_v41  ;;  %v871_v1 = vmax.f32.f32 %v455_v46, %v855_v50 }
 0x14a   :  { %v360_v5 = vsel %vm346_vm2, %v2404_v61, %v2402_v44  ;;  %v377_v23 = vsel %vm363_vm3, %v2404_v61, %v2402_v44 }
 0x14b   :  { %v393_v47 = vadd.f32 %v360_v5, %v2136_v13  ;;  %v1255_v36 = vsub.f32 %v1223_v35, %v2439_v62  ;;  %v840_v30 = vsub.f32 %v808_v49, %v2436_v52 }
 0x14c   :  { %v2408_v56 = vpop.permute.xlu1 %726 }
 0x14d   :  { %v2410_v57 = vpop.permute.xlu0 %678  ;;  %v409_v60 = vadd.f32 %v393_v47, %v377_v23  ;;  %v856_v6 = vand.u32 2147483647, %v840_v30 }
 0x14e   :  { %v761_v19 = vsel %vm346_vm2, %v2410_v57, %v2408_v56  ;;  %v777_v8 = vsel %vm363_vm3, %v2410_v57, %v2408_v56 }
 0x14f   :  { %v793_v27 = vadd.f32 %v761_v19, %v2146_v59  ;;  %v441_v42 = vsub.f32 %v409_v60, %v2442_v54 }
 0x150   :  { %v2422_v4 = vpop.permute.xlu1 %1140 }
 0x151   :  { %v1093_v7 = vpop.permute.xlu0 %1092  ;;  %v809_v29 = vadd.f32 %v793_v27, %v777_v8 }
 0x152   :  { %v1176_v25 = vsel %vm346_vm2, %v1093_v7, %v2422_v4  ;;  %v1192_v55 = vsel %vm363_vm3, %v1093_v7, %v2422_v4  ;;  %v454_v7 = vand.u32 2147483647, %v438_v53  ;;  %v1271_v53 = vand.u32 2147483647, %v1255_v36 }
 0x153   :  { %v1208_v22 = vadd.f32 %v1176_v25, %v2183_v63  ;;  %v408_v63 = vadd.f32 %v392_v15, %v376_v45  ;;  %v841_v44 = vsub.f32 %v809_v29, %v2445_v33 }
 0x154   :  { %v2450_v14 = vpop.permute.xlu1 %326  ;;  %v870_v58 = vmax.f32.f32 %v454_v7, %v854_v9  ;;  %v1287_v41 = vsub.f32 %v871_v1, %v1271_v53 }
 0x155   :  { %v2462_v32 = vpop.permute.xlu0 %278  ;;  %v1224_v12 = vadd.f32 %v1208_v22, %v1192_v55 }
 0x156   :  { %v361_v0 = vsel %vm346_vm2, %v2462_v32, %v2450_v14  ;;  %v1286_v9 = vsub.f32 %v870_v58, %v1270_v48 }
 0x157   :  { %v394_v62 = vadd.f32 %v361_v0, %v2201_v16  ;;  %v378_v16 = vsel %vm363_vm3, %v2462_v32, %v2450_v14  ;;  %v1242_v32 = vmul.f32 9.0, %v2238_v10 }
 0x158   :  { %v729_v38 = vpop.permute.xlu1 %728 }
 0x159   :  { %v681_v3 = vpop.permute.xlu0 %680  ;;  %v410_v27 = vadd.f32 %v394_v62, %v378_v16 }
 0x15a   :  { %v762_v59 = vsel %vm346_vm2, %v681_v3, %v729_v38  ;;  %v778_v61 = vsel %vm363_vm3, %v681_v3, %v729_v38  ;;  %v857_v3 = vand.u32 2147483647, %v841_v44 }
 0x15b   :  { %v794_v56 = vadd.f32 %v762_v59, %v2226_v11  ;;  %v1256_v11 = vsub.f32 %v1224_v12, %v2448_v39  ;;  %v1302_v59 = vand.u32 2147483647, %v1286_v9 }
 0x15c   :  { %v1143_v17 = vpop.permute.xlu1 %1142 }
 0x15d   :  { %v1095_v21 = vpop.permute.xlu0 %1094  ;;  %v810_v15 = vadd.f32 %v794_v56, %v778_v61  ;;  %v1272_v22 = vand.u32 2147483647, %v1256_v11  ;;  %v2686_v11 = vld [vmem:[#allocation15_spill] sm:$0xff] }
 0x15e   :  { %v1177_v43 = vsel %vm346_vm2, %v1095_v21, %v1143_v17  ;;  %v1193_v57 = vsel %vm363_vm3, %v1095_v21, %v1143_v17  ;;  %v457_v17 = vand.u32 2147483647, %v441_v42  ;;  %v442_v21 = vsub.f32 %v410_v27, %v2453_v37 }
 0x15f   :  { %v1209_v13 = vadd.f32 %v1177_v43, %v2246_v28  ;;  %v440_v28 = vsub.f32 %v408_v63, %v2429_v40  ;;  %v842_v54 = vsub.f32 %v810_v15, %v2465_v20  ;;  %v1303_v43 = vand.u32 2147483647, %v1287_v41 }
 0x160   :  { %v329_v4 = vpop.permute.xlu1 %328  ;;  %v873_v63 = vmax.f32.f32 %v457_v17, %v857_v3  ;;  %v1328_v37 = vsel %vm1308_vm4, %v1302_v59, 0.0  ;;  %v458_v56 = vand.u32 2147483647, %v442_v21 }
 0x161   :  { %v1225_v19 = vadd.f32 %v1209_v13, %v1193_v57  ;;  %v281_v25 = vpop.permute.xlu0 %280  ;;  %v456_v39 = vand.u32 2147483647, %v440_v28  ;;  %v858_v29 = vand.u32 2147483647, %v842_v54  ;;  %v2684_v57 = vld [vmem:[#allocation39_spill] sm:$0xff]  ;;  %v1330_v46 = vsel %vm1308_vm4, %v1303_v43, 0.0 }
 0x162   :  { %v362_v52 = vsel %vm346_vm2, %v281_v25, %v329_v4  ;;  %v1329_v61 = vadd.f32 %v1328_v37, %v2686_v11 }
 0x163   :  { %v1257_v40 = vsub.f32 %v1225_v19, %v2475_v2  ;;  %v395_v50 = vadd.f32 %v362_v52, %v2269_v31  ;;  %v872_v2 = vmax.f32.f32 %v456_v39, %v856_v6  ;;  %v379_v31 = vsel %vm363_vm3, %v281_v25, %v329_v4  ;;  %v2685_v19 = vld [vmem:[#allocation40_spill] sm:$0xff] }
 0x164   :  { %v731_v5 = vpop.permute.xlu1 %730  ;;  %v1243_v4 = vmul.f32 9.0, %v2684_v57  ;;  %v874_v48 = vmax.f32.f32 %v458_v56, %v858_v29 }
 0x165   :  { %v683_v33 = vpop.permute.xlu0 %682  ;;  %v1273_v18 = vand.u32 2147483647, %v1257_v40  ;;  %v1288_v8 = vsub.f32 %v872_v2, %v1272_v22  ;;  %v411_v20 = vadd.f32 %v395_v50, %v379_v31 }
 0x166   :  { %v763_v38 = vsel %vm346_vm2, %v683_v33, %v731_v5  ;;  %v779_v35 = vsel %vm363_vm3, %v683_v33, %v731_v5 }
 0x167   :  { %v795_v45 = vadd.f32 %v763_v38, %v2298_v34  ;;  %v1289_v0 = vsub.f32 %v873_v63, %v1273_v18  ;;  %v1304_v30 = vand.u32 2147483647, %v1288_v8 }
 0x168   :  { %v1145_v14 = vpop.permute.xlu1 %1144 }
 0x169   :  { %v811_v49 = vadd.f32 %v795_v45, %v779_v35  ;;  %v1097_v47 = vpop.permute.xlu0 %1096  ;;  %v1305_v28 = vand.u32 2147483647, %v1289_v0  ;;  %v1332_v52 = vsel %vm1308_vm4, %v1304_v30, 0.0 }
 0x16a   :  { %v1178_v34 = vsel %vm346_vm2, %v1097_v47, %v1145_v14  ;;  %v1194_v10 = vsel %vm363_vm3, %v1097_v47, %v1145_v14 }
 0x16b   :  { %v1210_v55 = vadd.f32 %v1178_v34, %v2306_v51  ;;  %v843_v13 = vsub.f32 %v811_v49, %v2489_v24  ;;  %v443_v51 = vsub.f32 %v411_v20, %v2486_v26  ;;  %v1331_v26 = vadd.f32 %v1330_v46, %v1329_v61 }
 0x16c   :  { %v1147_v12 = vpop.permute.xlu1 %1146  ;;  %v1334_v16 = vsel %vm1308_vm4, %v1305_v28, 0.0 }
 0x16d   :  { %v1226_v36 = vadd.f32 %v1210_v55, %v1194_v10  ;;  %v1099_v23 = vpop.permute.xlu0 %1098  ;;  %v859_v62 = vand.u32 2147483647, %v843_v13  ;;  %v459_v1 = vand.u32 2147483647, %v443_v51  ;;  %v1333_v40 = vadd.f32 %v1332_v52, %v1331_v26 }
 0x16e   :  { %v1179_v7 = vsel %vm346_vm2, %v1099_v23, %v1147_v12  ;;  %v1195_v24 = vsel %vm363_vm3, %v1099_v23, %v1147_v12 }
 0x16f   :  { %v1258_v60 = vsub.f32 %v1226_v36, %v1242_v32  ;;  %v1211_v25 = vadd.f32 %v1179_v7, %v2685_v19  ;;  %v875_v6 = vmax.f32.f32 %v459_v1, %v859_v62  ;;  %v1335_v39 = vadd.f32 %v1334_v16, %v1333_v40 }
 0x171   :  { %v1274_v58 = vand.u32 2147483647, %v1258_v60  ;;  %v1227_v44 = vadd.f32 %v1211_v25, %v1195_v24 }
 0x173   :  { %v1259_v53 = vsub.f32 %v1227_v44, %v1243_v4  ;;  %v1290_v15 = vsub.f32 %v874_v48, %v1274_v58 }
 0x175   :  { %v1275_v5 = vand.u32 2147483647, %v1259_v53  ;;  %v1306_v42 = vand.u32 2147483647, %v1290_v15 }
 0x177   :  { %v1291_v33 = vsub.f32 %v875_v6, %v1275_v5  ;;  %v1336_v9 = vsel %vm1308_vm4, %v1306_v42, 0.0 }
 0x178   :  { %v1337_v38 = vadd.f32 %v1336_v9, %v1335_v39 }
 0x179   :  { %v1307_v27 = vand.u32 2147483647, %v1291_v33 }
 0x17b   :  { %v1338_v3 = vsel %vm1308_vm4, %v1307_v27, 0.0 }
 0x17c   :  { %v1339_v22 = vadd.f32 %v1338_v3, %v1337_v38 }
 0x17e   :  { %1340 = vadd.xlane.f32.xlu0 %v1339_v22 }
 0x20b   :  { %v1341_v50 = vpop.xlane.xlu0 %1340 }
 0x20c   :  { %v1342_v45 = vrot.slane %v1341_v50, 4 }
 0x20e   :  { %v1343_v41 = vadd.f32 %v1342_v45, %v1341_v50 }
 0x210   :  { %v1344_v54 = vrot.slane %v1343_v41, 2 }
 0x212   :  { %v1345_v35 = vadd.f32 %v1344_v54, %v1343_v41 }
 0x214   :  { %v1346_v14 = vrot.slane %v1345_v35, 1 }
 0x216   :  { %v1347_v32 = vadd.f32 %v1346_v14, %v1345_v35 }
 0x218   :  { %1366 = vpush %v1347_v32 }
 0x249   :  { %s1367_s22 = spop %1366 }
 0x24a   :  { %1350 = sst [smem:[#allocation8]] %s1367_s22 }
 0x24b   :  { %1455 = shalt.err (!%p1452_p12)
}
 0x24c   :  { %s1469_s30 = smov [#allocation8]  }
 0x24d   :  { %1358 = dma.smem_to_hbm %s1469_s30, 16, %s2578_s3, [#allocation4]  }
 0x24e   :  { %1460 = dma.done.wait [#allocation4], 16  }
 0x24f   :  { %1461 = vsyncadd [#allocation4], 4294967280 }
 0x250   :  { %1362 = sfence }
 0x251   :  { %1363 = vsyncpa [#allocation3], 1 }
 0x252   :  { %1364 = vsyncpa [#allocation6], 1 }
 0x253   :  { %1365 = vsyncpa [#allocation4], 1 }

</bundles_post_ra>
